<compile_context>
chip_gen: v7x
topology: tpu7x:2x2x1
jax: 0.10.0
libtpu: 0.0.40
codegen_flags: <defaults>
</compile_context>

<pallas_src>
import jax
import jax.numpy as jnp
from jax import lax
from jax.experimental import pallas as pl
from jax.experimental.pallas import tpu as pltpu

VOCAB = 256
HIDDEN = 32
SOS_TOKEN = 0  # decoder_input = LongTensor([[0]])


def seq2seq_kernel(enc_xg_ref,   # VMEM (S, 4H)     f32  precomputed enc gate rows
                   dec_tab_ref,  # VMEM (V, 1, 4H)  f32  emb @ W_ih_dec^T + b (row-addressable)
                   we_hh_ref,    # VMEM (H, 4H)     f32  encoder W_hh^T
                   w_dec_ref,    # VMEM (H, 4H+V)   f32  [decoder W_hh^T | proj W^T]
                   bp_ref,       # VMEM (1, V)      f32  projection bias
                   out_ref):     # VMEM (T, V)      f32  softmax outputs
    S, G = enc_xg_ref.shape            # G = 4H
    H = we_hh_ref.shape[0]
    T, V = out_ref.shape

    we_hh = we_hh_ref[...]             # (H, 4H)
    w_dec = w_dec_ref[...]             # (H, 4H+V)
    bp = bp_ref[...]                   # (1, V)

    def cell(gates, c):
        # One EUP pass each over the full (1,4H) vreg, then slice per gate.
        sg = jax.nn.sigmoid(gates)
        tg = jnp.tanh(gates)
        i = sg[:, 0 * H:1 * H]
        f = sg[:, 1 * H:2 * H]
        g = tg[:, 2 * H:3 * H]
        o = sg[:, 3 * H:4 * H]
        c_new = f * c + i * g
        h_new = o * jnp.tanh(c_new)
        return h_new, c_new

    # ---- encoder: LSTM over the input sequence (zero initial state) ----
    h = jnp.zeros((1, H), jnp.float32)
    c = jnp.zeros((1, H), jnp.float32)
    for t in range(S):                                   # static, fully unrolled
        xg = enc_xg_ref[pl.ds(t, 1), :]                  # (1,4H) static row
        gates = xg + jnp.dot(h, we_hh, preferred_element_type=jnp.float32)
        h, c = cell(gates, c)

    # ---- decoder: greedy decode, one fused MXU push per step ----
    # fused[:, :G]  = h @ W_hh_dec^T   (gate contribution for the NEXT step)
    # fused[:, G:]  = h @ W_proj^T     (logits for THIS step, + bp)
    fused = jnp.dot(h, w_dec, preferred_element_type=jnp.float32)   # seed from h_enc
    xg = dec_tab_ref[SOS_TOKEN]                          # (1,4H) static SOS row
    lane = lax.broadcasted_iota(jnp.int32, (1, V), 1)

    for t in range(T):                                   # static, fully unrolled
        gates = xg + fused[:, :G]
        h, c = cell(gates, c)
        fused = jnp.dot(h, w_dec, preferred_element_type=jnp.float32)  # (1, 4H+V)
        logits = fused[:, G:] + bp                                     # (1, V)

        # Greedy feedback token straight from the logits (lowest index on
        # ties, like torch.max/topk).  Fill value V-1 keeps the index in
        # bounds even if logits were NaN (no runtime OOB check on VMEM refs).
        m = jnp.max(logits, axis=-1, keepdims=True)
        tok = jnp.min(jnp.where(logits >= m, lane, V - 1))
        xg = dec_tab_ref[tok]                            # (1,4H) next-step gate row

        # softmax over vocab (F.softmax dim=1) -- exact division, side work.
        e = jnp.exp(logits - m)
        probs = e / jnp.sum(e, axis=-1, keepdims=True)
        out_ref[pl.ds(t, 1), :] = probs


def init_params(key, vocab_size=VOCAB, hidden_size=HIDDEN):
    """Deterministic parameter init mirroring the nn.Module shapes."""
    ks = jax.random.split(key, 11)
    s = 1.0 / jnp.sqrt(jnp.float32(hidden_size))

    def uni(k, shape):
        return jax.random.uniform(k, shape, jnp.float32, minval=-s, maxval=s)

    return dict(
        embedding=jax.random.normal(ks[0], (vocab_size, hidden_size), jnp.float32),
        enc_w_ih=uni(ks[1], (4 * hidden_size, hidden_size)),
        enc_w_hh=uni(ks[2], (4 * hidden_size, hidden_size)),
        enc_b_ih=uni(ks[3], (4 * hidden_size,)),
        enc_b_hh=uni(ks[4], (4 * hidden_size,)),
        dec_w_ih=uni(ks[5], (4 * hidden_size, hidden_size)),
        dec_w_hh=uni(ks[6], (4 * hidden_size, hidden_size)),
        dec_b_ih=uni(ks[7], (4 * hidden_size,)),
        dec_b_hh=uni(ks[8], (4 * hidden_size,)),
        proj_w=uni(ks[9], (vocab_size, hidden_size)),
        proj_b=uni(ks[10], (vocab_size,)),
    )


def prepare_params(params):
    """One-time layout plumbing + input-gate table precompute (hoisted out of
    the per-call forward path)."""
    hp = lax.Precision.HIGHEST
    emb = params["embedding"]                              # (V, H)
    V, H = emb.shape
    be = (params["enc_b_ih"] + params["enc_b_hh"]).reshape(1, 4 * H)
    bd = (params["dec_b_ih"] + params["dec_b_hh"]).reshape(1, 4 * H)
    enc_tab = (jnp.dot(emb, params["enc_w_ih"].T, precision=hp) + be)   # (V, 4H)
    dec_tab = (jnp.dot(emb, params["dec_w_ih"].T, precision=hp) + bd)   # (V, 4H)
    w_dec_fused = jnp.concatenate(                                       # (H, 4H+V)
        [params["dec_w_hh"].T, params["proj_w"].T], axis=1)
    return dict(
        enc_tab=enc_tab.astype(jnp.float32),                    # (V, 4H) for host gather
        dec_tab3=dec_tab.astype(jnp.float32).reshape(V, 1, 4 * H),
        we_hh_t=params["enc_w_hh"].T.astype(jnp.float32),        # (H, 4H)
        w_dec_fused=w_dec_fused.astype(jnp.float32),             # (H, 4H+V)
        bp=params["proj_b"].reshape(1, V).astype(jnp.float32),   # (1, V)
        vocab=V,
        hidden=H,
    )


def seq2seq_forward(inputs, targets, prep):
    """inputs: (S,) int32 token ids; targets: (T,) (only its length is used)."""
    T = int(targets.shape[0])
    V = prep["vocab"]

    # Encoder gate rows as one dense slab (plain XLA gather, outside the kernel).
    enc_xg = jnp.take(prep["enc_tab"], inputs.astype(jnp.int32), axis=0)  # (S, 4H)

    vmem = pl.BlockSpec(memory_space=pltpu.MemorySpace.VMEM)
    return pl.pallas_call(
        seq2seq_kernel,
        out_shape=jax.ShapeDtypeStruct((T, V), jnp.float32),
        in_specs=[vmem] * 5,
        out_specs=vmem,
    )(enc_xg, prep["dec_tab3"], prep["we_hh_t"], prep["w_dec_fused"], prep["bp"])


def reference_forward(params, inputs, T, feedback_tokens=None):
    """Pure-JAX mirror of the PyTorch module.  If feedback_tokens is given,
    those tokens are used as the greedy feedback (lets us verify per-step math
    without near-tie argmax choices cascading)."""
    hp = lax.Precision.HIGHEST
    emb = params["embedding"]
    H = emb.shape[1]

    def lstm(x, h, c, w_ih, w_hh, b_ih, b_hh):
        gates = (jnp.dot(x, w_ih.T, precision=hp) + b_ih
                 + jnp.dot(h, w_hh.T, precision=hp) + b_hh)
        i, f, g, o = jnp.split(gates, 4, axis=-1)
        c = jax.nn.sigmoid(f) * c + jax.nn.sigmoid(i) * jnp.tanh(g)
        h = jax.nn.sigmoid(o) * jnp.tanh(c)
        return h, c

    h = jnp.zeros((1, H), jnp.float32)
    c = jnp.zeros((1, H), jnp.float32)
    for t in range(inputs.shape[0]):
        x = emb[inputs[t]][None, :]
        h, c = lstm(x, h, c, params["enc_w_ih"], params["enc_w_hh"],
                    params["enc_b_ih"], params["enc_b_hh"])

    tok = SOS_TOKEN
    outs = []
    for t in range(T):
        x = emb[tok][None, :]
        h, c = lstm(x, h, c, params["dec_w_ih"], params["dec_w_hh"],
                    params["dec_b_ih"], params["dec_b_hh"])
        logits = jnp.dot(h, params["proj_w"].T, precision=hp) + params["proj_b"]
        probs = jax.nn.softmax(logits, axis=-1)
        outs.append(probs[0])
        if feedback_tokens is not None:
            tok = int(feedback_tokens[t])
        else:
            tok = int(jnp.argmax(logits))
    return jnp.stack(outs)


if __name__ == "__main__":
    S, T = 8, 8
    key = jax.random.PRNGKey(0)
    k_in, k_tgt, k_par = jax.random.split(key, 3)
    inputs = jax.random.randint(k_in, (S,), 0, VOCAB, dtype=jnp.int32)
    targets = jax.random.randint(k_tgt, (T,), 0, VOCAB, dtype=jnp.int32)

    params = init_params(k_par, VOCAB, HIDDEN)
    prep = prepare_params(params)

    out = seq2seq_forward(inputs, targets, prep)
    out = jax.block_until_ready(out)

    assert out.shape == (T, VOCAB), out.shape
    assert bool(jnp.all(jnp.isfinite(out)))
    # each row is an exact softmax distribution over the vocab
    assert bool(jnp.allclose(jnp.sum(out, axis=-1), 1.0, atol=1e-3))

    # Per-step math check vs. pure-JAX reference, driven by the kernel's own
    # greedy tokens so argmax near-ties cannot cascade into false mismatches.
    kern_tokens = jnp.argmax(out, axis=-1)
    ref = reference_forward(params, inputs, T, feedback_tokens=kern_tokens)
    assert bool(jnp.allclose(out, ref, atol=5e-3)), float(jnp.max(jnp.abs(out - ref)))

    print("KERNEL_OK")
</pallas_src>

<mosaic_0001>
module attributes {stable_mosaic.version = 11 : i64} {
  func.func @seq2seq_kernel(%arg0: memref<8x128xf32, #tpu.memory_space<vmem>>, %arg1: memref<256x1x128xf32, #tpu.memory_space<vmem>>, %arg2: memref<32x128xf32, #tpu.memory_space<vmem>>, %arg3: memref<32x384xf32, #tpu.memory_space<vmem>>, %arg4: memref<1x256xf32, #tpu.memory_space<vmem>>, %arg5: memref<8x256xf32, #tpu.memory_space<vmem>>) attributes {dimension_semantics = [], scalar_prefetch = 0 : i64, scratch_operands = 0 : i64, tpu.core_type = #tpu.core_type<tc>} {
    %c0 = arith.constant 0 : index
    %c0_0 = arith.constant 0 : index
    %0 = vector.load %arg2[%c0, %c0_0] : memref<32x128xf32, #tpu.memory_space<vmem>>, vector<32x128xf32>
    %c0_1 = arith.constant 0 : index
    %c0_2 = arith.constant 0 : index
    %1 = vector.load %arg3[%c0_1, %c0_2] : memref<32x384xf32, #tpu.memory_space<vmem>>, vector<32x384xf32>
    %c0_3 = arith.constant 0 : index
    %c0_4 = arith.constant 0 : index
    %2 = vector.load %arg4[%c0_3, %c0_4] : memref<1x256xf32, #tpu.memory_space<vmem>>, vector<1x256xf32>
    %cst = arith.constant 0.000000e+00 : f32
    %3 = vector.broadcast %cst : f32 to vector<1x32xf32>
    %cst_5 = arith.constant 0.000000e+00 : f32
    %4 = vector.broadcast %cst_5 : f32 to vector<1x32xf32>
    %c0_6 = arith.constant 0 : index
    %c0_7 = arith.constant 0 : index
    %5 = vector.load %arg0[%c0_6, %c0_7] : memref<8x128xf32, #tpu.memory_space<vmem>>, vector<1x128xf32>
    %cst_8 = arith.constant dense<0.000000e+00> : vector<1x128xf32>
    %6 = tpu.matmul %3, %0, %cst_8 {dimension_numbers = #tpu.dot_dimension_numbers<[1], [0], [0], [1], [0, 0, 1, 1], [], []>} : vector<1x32xf32>, vector<32x128xf32>, vector<1x128xf32> -> vector<1x128xf32>
    %7 = arith.addf %5, %6 : vector<1x128xf32>
    %8 = arith.negf %7 : vector<1x128xf32>
    %9 = math.exp %8 : vector<1x128xf32>
    %cst_9 = arith.constant 1.000000e+00 : f32
    %10 = vector.broadcast %cst_9 : f32 to vector<1x128xf32>
    %11 = arith.addf %10, %9 : vector<1x128xf32>
    %12 = arith.divf %10, %11 : vector<1x128xf32>
    %13 = math.tanh %7 : vector<1x128xf32>
    %14 = vector.extract_strided_slice %12 {offsets = [0, 0], sizes = [1, 32], strides = [1, 1]} : vector<1x128xf32> to vector<1x32xf32>
    %15 = vector.extract_strided_slice %12 {offsets = [0, 32], sizes = [1, 32], strides = [1, 1]} : vector<1x128xf32> to vector<1x32xf32>
    %16 = vector.extract_strided_slice %13 {offsets = [0, 64], sizes = [1, 32], strides = [1, 1]} : vector<1x128xf32> to vector<1x32xf32>
    %17 = vector.extract_strided_slice %12 {offsets = [0, 96], sizes = [1, 32], strides = [1, 1]} : vector<1x128xf32> to vector<1x32xf32>
    %18 = arith.mulf %15, %4 : vector<1x32xf32>
    %19 = arith.mulf %14, %16 : vector<1x32xf32>
    %20 = arith.addf %18, %19 : vector<1x32xf32>
    %21 = math.tanh %20 : vector<1x32xf32>
    %22 = arith.mulf %17, %21 : vector<1x32xf32>
    %c1 = arith.constant 1 : index
    %c0_10 = arith.constant 0 : index
    %23 = vector.load %arg0[%c1, %c0_10] : memref<8x128xf32, #tpu.memory_space<vmem>>, vector<1x128xf32>
    %cst_11 = arith.constant dense<0.000000e+00> : vector<1x128xf32>
    %24 = tpu.matmul %22, %0, %cst_11 {dimension_numbers = #tpu.dot_dimension_numbers<[1], [0], [0], [1], [0, 0, 1, 1], [], []>} : vector<1x32xf32>, vector<32x128xf32>, vector<1x128xf32> -> vector<1x128xf32>
    %25 = arith.addf %23, %24 : vector<1x128xf32>
    %26 = arith.negf %25 : vector<1x128xf32>
    %27 = math.exp %26 : vector<1x128xf32>
    %cst_12 = arith.constant 1.000000e+00 : f32
    %28 = vector.broadcast %cst_12 : f32 to vector<1x128xf32>
    %29 = arith.addf %28, %27 : vector<1x128xf32>
    %30 = arith.divf %28, %29 : vector<1x128xf32>
    %31 = math.tanh %25 : vector<1x128xf32>
    %32 = vector.extract_strided_slice %30 {offsets = [0, 0], sizes = [1, 32], strides = [1, 1]} : vector<1x128xf32> to vector<1x32xf32>
    %33 = vector.extract_strided_slice %30 {offsets = [0, 32], sizes = [1, 32], strides = [1, 1]} : vector<1x128xf32> to vector<1x32xf32>
    %34 = vector.extract_strided_slice %31 {offsets = [0, 64], sizes = [1, 32], strides = [1, 1]} : vector<1x128xf32> to vector<1x32xf32>
    %35 = vector.extract_strided_slice %30 {offsets = [0, 96], sizes = [1, 32], strides = [1, 1]} : vector<1x128xf32> to vector<1x32xf32>
    %36 = arith.mulf %33, %20 : vector<1x32xf32>
    %37 = arith.mulf %32, %34 : vector<1x32xf32>
    %38 = arith.addf %36, %37 : vector<1x32xf32>
    %39 = math.tanh %38 : vector<1x32xf32>
    %40 = arith.mulf %35, %39 : vector<1x32xf32>
    %c2 = arith.constant 2 : index
    %c0_13 = arith.constant 0 : index
    %41 = vector.load %arg0[%c2, %c0_13] : memref<8x128xf32, #tpu.memory_space<vmem>>, vector<1x128xf32>
    %cst_14 = arith.constant dense<0.000000e+00> : vector<1x128xf32>
    %42 = tpu.matmul %40, %0, %cst_14 {dimension_numbers = #tpu.dot_dimension_numbers<[1], [0], [0], [1], [0, 0, 1, 1], [], []>} : vector<1x32xf32>, vector<32x128xf32>, vector<1x128xf32> -> vector<1x128xf32>
    %43 = arith.addf %41, %42 : vector<1x128xf32>
    %44 = arith.negf %43 : vector<1x128xf32>
    %45 = math.exp %44 : vector<1x128xf32>
    %cst_15 = arith.constant 1.000000e+00 : f32
    %46 = vector.broadcast %cst_15 : f32 to vector<1x128xf32>
    %47 = arith.addf %46, %45 : vector<1x128xf32>
    %48 = arith.divf %46, %47 : vector<1x128xf32>
    %49 = math.tanh %43 : vector<1x128xf32>
    %50 = vector.extract_strided_slice %48 {offsets = [0, 0], sizes = [1, 32], strides = [1, 1]} : vector<1x128xf32> to vector<1x32xf32>
    %51 = vector.extract_strided_slice %48 {offsets = [0, 32], sizes = [1, 32], strides = [1, 1]} : vector<1x128xf32> to vector<1x32xf32>
    %52 = vector.extract_strided_slice %49 {offsets = [0, 64], sizes = [1, 32], strides = [1, 1]} : vector<1x128xf32> to vector<1x32xf32>
    %53 = vector.extract_strided_slice %48 {offsets = [0, 96], sizes = [1, 32], strides = [1, 1]} : vector<1x128xf32> to vector<1x32xf32>
    %54 = arith.mulf %51, %38 : vector<1x32xf32>
    %55 = arith.mulf %50, %52 : vector<1x32xf32>
    %56 = arith.addf %54, %55 : vector<1x32xf32>
    %57 = math.tanh %56 : vector<1x32xf32>
    %58 = arith.mulf %53, %57 : vector<1x32xf32>
    %c3 = arith.constant 3 : index
    %c0_16 = arith.constant 0 : index
    %59 = vector.load %arg0[%c3, %c0_16] : memref<8x128xf32, #tpu.memory_space<vmem>>, vector<1x128xf32>
    %cst_17 = arith.constant dense<0.000000e+00> : vector<1x128xf32>
    %60 = tpu.matmul %58, %0, %cst_17 {dimension_numbers = #tpu.dot_dimension_numbers<[1], [0], [0], [1], [0, 0, 1, 1], [], []>} : vector<1x32xf32>, vector<32x128xf32>, vector<1x128xf32> -> vector<1x128xf32>
    %61 = arith.addf %59, %60 : vector<1x128xf32>
    %62 = arith.negf %61 : vector<1x128xf32>
    %63 = math.exp %62 : vector<1x128xf32>
    %cst_18 = arith.constant 1.000000e+00 : f32
    %64 = vector.broadcast %cst_18 : f32 to vector<1x128xf32>
    %65 = arith.addf %64, %63 : vector<1x128xf32>
    %66 = arith.divf %64, %65 : vector<1x128xf32>
    %67 = math.tanh %61 : vector<1x128xf32>
    %68 = vector.extract_strided_slice %66 {offsets = [0, 0], sizes = [1, 32], strides = [1, 1]} : vector<1x128xf32> to vector<1x32xf32>
    %69 = vector.extract_strided_slice %66 {offsets = [0, 32], sizes = [1, 32], strides = [1, 1]} : vector<1x128xf32> to vector<1x32xf32>
    %70 = vector.extract_strided_slice %67 {offsets = [0, 64], sizes = [1, 32], strides = [1, 1]} : vector<1x128xf32> to vector<1x32xf32>
    %71 = vector.extract_strided_slice %66 {offsets = [0, 96], sizes = [1, 32], strides = [1, 1]} : vector<1x128xf32> to vector<1x32xf32>
    %72 = arith.mulf %69, %56 : vector<1x32xf32>
    %73 = arith.mulf %68, %70 : vector<1x32xf32>
    %74 = arith.addf %72, %73 : vector<1x32xf32>
    %75 = math.tanh %74 : vector<1x32xf32>
    %76 = arith.mulf %71, %75 : vector<1x32xf32>
    %c4 = arith.constant 4 : index
    %c0_19 = arith.constant 0 : index
    %77 = vector.load %arg0[%c4, %c0_19] : memref<8x128xf32, #tpu.memory_space<vmem>>, vector<1x128xf32>
    %cst_20 = arith.constant dense<0.000000e+00> : vector<1x128xf32>
    %78 = tpu.matmul %76, %0, %cst_20 {dimension_numbers = #tpu.dot_dimension_numbers<[1], [0], [0], [1], [0, 0, 1, 1], [], []>} : vector<1x32xf32>, vector<32x128xf32>, vector<1x128xf32> -> vector<1x128xf32>
    %79 = arith.addf %77, %78 : vector<1x128xf32>
    %80 = arith.negf %79 : vector<1x128xf32>
    %81 = math.exp %80 : vector<1x128xf32>
    %cst_21 = arith.constant 1.000000e+00 : f32
    %82 = vector.broadcast %cst_21 : f32 to vector<1x128xf32>
    %83 = arith.addf %82, %81 : vector<1x128xf32>
    %84 = arith.divf %82, %83 : vector<1x128xf32>
    %85 = math.tanh %79 : vector<1x128xf32>
    %86 = vector.extract_strided_slice %84 {offsets = [0, 0], sizes = [1, 32], strides = [1, 1]} : vector<1x128xf32> to vector<1x32xf32>
    %87 = vector.extract_strided_slice %84 {offsets = [0, 32], sizes = [1, 32], strides = [1, 1]} : vector<1x128xf32> to vector<1x32xf32>
    %88 = vector.extract_strided_slice %85 {offsets = [0, 64], sizes = [1, 32], strides = [1, 1]} : vector<1x128xf32> to vector<1x32xf32>
    %89 = vector.extract_strided_slice %84 {offsets = [0, 96], sizes = [1, 32], strides = [1, 1]} : vector<1x128xf32> to vector<1x32xf32>
    %90 = arith.mulf %87, %74 : vector<1x32xf32>
    %91 = arith.mulf %86, %88 : vector<1x32xf32>
    %92 = arith.addf %90, %91 : vector<1x32xf32>
    %93 = math.tanh %92 : vector<1x32xf32>
    %94 = arith.mulf %89, %93 : vector<1x32xf32>
    %c5 = arith.constant 5 : index
    %c0_22 = arith.constant 0 : index
    %95 = vector.load %arg0[%c5, %c0_22] : memref<8x128xf32, #tpu.memory_space<vmem>>, vector<1x128xf32>
    %cst_23 = arith.constant dense<0.000000e+00> : vector<1x128xf32>
    %96 = tpu.matmul %94, %0, %cst_23 {dimension_numbers = #tpu.dot_dimension_numbers<[1], [0], [0], [1], [0, 0, 1, 1], [], []>} : vector<1x32xf32>, vector<32x128xf32>, vector<1x128xf32> -> vector<1x128xf32>
    %97 = arith.addf %95, %96 : vector<1x128xf32>
    %98 = arith.negf %97 : vector<1x128xf32>
    %99 = math.exp %98 : vector<1x128xf32>
    %cst_24 = arith.constant 1.000000e+00 : f32
    %100 = vector.broadcast %cst_24 : f32 to vector<1x128xf32>
    %101 = arith.addf %100, %99 : vector<1x128xf32>
    %102 = arith.divf %100, %101 : vector<1x128xf32>
    %103 = math.tanh %97 : vector<1x128xf32>
    %104 = vector.extract_strided_slice %102 {offsets = [0, 0], sizes = [1, 32], strides = [1, 1]} : vector<1x128xf32> to vector<1x32xf32>
    %105 = vector.extract_strided_slice %102 {offsets = [0, 32], sizes = [1, 32], strides = [1, 1]} : vector<1x128xf32> to vector<1x32xf32>
    %106 = vector.extract_strided_slice %103 {offsets = [0, 64], sizes = [1, 32], strides = [1, 1]} : vector<1x128xf32> to vector<1x32xf32>
    %107 = vector.extract_strided_slice %102 {offsets = [0, 96], sizes = [1, 32], strides = [1, 1]} : vector<1x128xf32> to vector<1x32xf32>
    %108 = arith.mulf %105, %92 : vector<1x32xf32>
    %109 = arith.mulf %104, %106 : vector<1x32xf32>
    %110 = arith.addf %108, %109 : vector<1x32xf32>
    %111 = math.tanh %110 : vector<1x32xf32>
    %112 = arith.mulf %107, %111 : vector<1x32xf32>
    %c6 = arith.constant 6 : index
    %c0_25 = arith.constant 0 : index
    %113 = vector.load %arg0[%c6, %c0_25] : memref<8x128xf32, #tpu.memory_space<vmem>>, vector<1x128xf32>
    %cst_26 = arith.constant dense<0.000000e+00> : vector<1x128xf32>
    %114 = tpu.matmul %112, %0, %cst_26 {dimension_numbers = #tpu.dot_dimension_numbers<[1], [0], [0], [1], [0, 0, 1, 1], [], []>} : vector<1x32xf32>, vector<32x128xf32>, vector<1x128xf32> -> vector<1x128xf32>
    %115 = arith.addf %113, %114 : vector<1x128xf32>
    %116 = arith.negf %115 : vector<1x128xf32>
    %117 = math.exp %116 : vector<1x128xf32>
    %cst_27 = arith.constant 1.000000e+00 : f32
    %118 = vector.broadcast %cst_27 : f32 to vector<1x128xf32>
    %119 = arith.addf %118, %117 : vector<1x128xf32>
    %120 = arith.divf %118, %119 : vector<1x128xf32>
    %121 = math.tanh %115 : vector<1x128xf32>
    %122 = vector.extract_strided_slice %120 {offsets = [0, 0], sizes = [1, 32], strides = [1, 1]} : vector<1x128xf32> to vector<1x32xf32>
    %123 = vector.extract_strided_slice %120 {offsets = [0, 32], sizes = [1, 32], strides = [1, 1]} : vector<1x128xf32> to vector<1x32xf32>
    %124 = vector.extract_strided_slice %121 {offsets = [0, 64], sizes = [1, 32], strides = [1, 1]} : vector<1x128xf32> to vector<1x32xf32>
    %125 = vector.extract_strided_slice %120 {offsets = [0, 96], sizes = [1, 32], strides = [1, 1]} : vector<1x128xf32> to vector<1x32xf32>
    %126 = arith.mulf %123, %110 : vector<1x32xf32>
    %127 = arith.mulf %122, %124 : vector<1x32xf32>
    %128 = arith.addf %126, %127 : vector<1x32xf32>
    %129 = math.tanh %128 : vector<1x32xf32>
    %130 = arith.mulf %125, %129 : vector<1x32xf32>
    %c7 = arith.constant 7 : index
    %c0_28 = arith.constant 0 : index
    %131 = vector.load %arg0[%c7, %c0_28] : memref<8x128xf32, #tpu.memory_space<vmem>>, vector<1x128xf32>
    %cst_29 = arith.constant dense<0.000000e+00> : vector<1x128xf32>
    %132 = tpu.matmul %130, %0, %cst_29 {dimension_numbers = #tpu.dot_dimension_numbers<[1], [0], [0], [1], [0, 0, 1, 1], [], []>} : vector<1x32xf32>, vector<32x128xf32>, vector<1x128xf32> -> vector<1x128xf32>
    %133 = arith.addf %131, %132 : vector<1x128xf32>
    %134 = arith.negf %133 : vector<1x128xf32>
    %135 = math.exp %134 : vector<1x128xf32>
    %cst_30 = arith.constant 1.000000e+00 : f32
    %136 = vector.broadcast %cst_30 : f32 to vector<1x128xf32>
    %137 = arith.addf %136, %135 : vector<1x128xf32>
    %138 = arith.divf %136, %137 : vector<1x128xf32>
    %139 = math.tanh %133 : vector<1x128xf32>
    %140 = vector.extract_strided_slice %138 {offsets = [0, 0], sizes = [1, 32], strides = [1, 1]} : vector<1x128xf32> to vector<1x32xf32>
    %141 = vector.extract_strided_slice %138 {offsets = [0, 32], sizes = [1, 32], strides = [1, 1]} : vector<1x128xf32> to vector<1x32xf32>
    %142 = vector.extract_strided_slice %139 {offsets = [0, 64], sizes = [1, 32], strides = [1, 1]} : vector<1x128xf32> to vector<1x32xf32>
    %143 = vector.extract_strided_slice %138 {offsets = [0, 96], sizes = [1, 32], strides = [1, 1]} : vector<1x128xf32> to vector<1x32xf32>
    %144 = arith.mulf %141, %128 : vector<1x32xf32>
    %145 = arith.mulf %140, %142 : vector<1x32xf32>
    %146 = arith.addf %144, %145 : vector<1x32xf32>
    %147 = math.tanh %146 : vector<1x32xf32>
    %148 = arith.mulf %143, %147 : vector<1x32xf32>
    %cst_31 = arith.constant dense<0.000000e+00> : vector<1x384xf32>
    %149 = tpu.matmul %148, %1, %cst_31 {dimension_numbers = #tpu.dot_dimension_numbers<[1], [0], [0], [1], [0, 0, 1, 1], [], []>} : vector<1x32xf32>, vector<32x384xf32>, vector<1x384xf32> -> vector<1x384xf32>
    %c0_32 = arith.constant 0 : index
    %c0_33 = arith.constant 0 : index
    %c0_34 = arith.constant 0 : index
    %150 = vector.load %arg1[%c0_32, %c0_33, %c0_34] : memref<256x1x128xf32, #tpu.memory_space<vmem>>, vector<1x1x128xf32>
    %151 = vector.shape_cast %150 : vector<1x1x128xf32> to vector<1x128xf32>
    %152 = tpu.iota {dimensions = array<i32: 1>} : vector<1x256xi32>
    %153 = vector.extract_strided_slice %149 {offsets = [0, 0], sizes = [1, 128], strides = [1, 1]} : vector<1x384xf32> to vector<1x128xf32>
    %154 = arith.addf %151, %153 : vector<1x128xf32>
    %155 = arith.negf %154 : vector<1x128xf32>
    %156 = math.exp %155 : vector<1x128xf32>
    %cst_35 = arith.constant 1.000000e+00 : f32
    %157 = vector.broadcast %cst_35 : f32 to vector<1x128xf32>
    %158 = arith.addf %157, %156 : vector<1x128xf32>
    %159 = arith.divf %157, %158 : vector<1x128xf32>
    %160 = math.tanh %154 : vector<1x128xf32>
    %161 = vector.extract_strided_slice %159 {offsets = [0, 0], sizes = [1, 32], strides = [1, 1]} : vector<1x128xf32> to vector<1x32xf32>
    %162 = vector.extract_strided_slice %159 {offsets = [0, 32], sizes = [1, 32], strides = [1, 1]} : vector<1x128xf32> to vector<1x32xf32>
    %163 = vector.extract_strided_slice %160 {offsets = [0, 64], sizes = [1, 32], strides = [1, 1]} : vector<1x128xf32> to vector<1x32xf32>
    %164 = vector.extract_strided_slice %159 {offsets = [0, 96], sizes = [1, 32], strides = [1, 1]} : vector<1x128xf32> to vector<1x32xf32>
    %165 = arith.mulf %162, %146 : vector<1x32xf32>
    %166 = arith.mulf %161, %163 : vector<1x32xf32>
    %167 = arith.addf %165, %166 : vector<1x32xf32>
    %168 = math.tanh %167 : vector<1x32xf32>
    %169 = arith.mulf %164, %168 : vector<1x32xf32>
    %cst_36 = arith.constant dense<0.000000e+00> : vector<1x384xf32>
    %170 = tpu.matmul %169, %1, %cst_36 {dimension_numbers = #tpu.dot_dimension_numbers<[1], [0], [0], [1], [0, 0, 1, 1], [], []>} : vector<1x32xf32>, vector<32x384xf32>, vector<1x384xf32> -> vector<1x384xf32>
    %171 = vector.extract_strided_slice %170 {offsets = [0, 128], sizes = [1, 256], strides = [1, 1]} : vector<1x384xf32> to vector<1x256xf32>
    %172 = arith.addf %171, %2 : vector<1x256xf32>
    %cst_37 = arith.constant dense<0xFF800000> : vector<1xf32>
    %173 = vector.multi_reduction <maximumf>, %172, %cst_37 [1] : vector<1x256xf32> to vector<1xf32>
    %174 = vector.shape_cast %173 : vector<1xf32> to vector<1x1xf32>
    %175 = vector.broadcast %174 : vector<1x1xf32> to vector<1x256xf32>
    %176 = arith.cmpf oge, %172, %175 : vector<1x256xf32>
    %c255_i32 = arith.constant 255 : i32
    %177 = vector.broadcast %c255_i32 : i32 to vector<1x256xi32>
    %178 = arith.select %176, %152, %177 : vector<1x256xi1>, vector<1x256xi32>
    %179 = vector.shape_cast %178 : vector<1x256xi32> to vector<1x1x256xi32>
    %cst_38 = arith.constant dense<2147483647> : vector<1xi32>
    %180 = vector.multi_reduction <minsi>, %179, %cst_38 [1, 2] : vector<1x1x256xi32> to vector<1xi32>
    %181 = vector.shape_cast %180 : vector<1xi32> to vector<1x1x1xi32>
    %182 = vector.extract %181[0, 0, 0] : i32 from vector<1x1x1xi32>
    %183 = arith.index_cast %182 : i32 to index
    %c0_39 = arith.constant 0 : index
    %c0_40 = arith.constant 0 : index
    %184 = vector.load %arg1[%183, %c0_39, %c0_40] : memref<256x1x128xf32, #tpu.memory_space<vmem>>, vector<1x1x128xf32>
    %185 = vector.shape_cast %184 : vector<1x1x128xf32> to vector<1x128xf32>
    %186 = vector.broadcast %174 : vector<1x1xf32> to vector<1x256xf32>
    %187 = arith.subf %172, %186 : vector<1x256xf32>
    %188 = math.exp %187 : vector<1x256xf32>
    %cst_41 = arith.constant dense<0.000000e+00> : vector<1xf32>
    %189 = vector.multi_reduction <add>, %188, %cst_41 [1] : vector<1x256xf32> to vector<1xf32>
    %190 = vector.shape_cast %189 : vector<1xf32> to vector<1x1xf32>
    %191 = vector.broadcast %190 : vector<1x1xf32> to vector<1x256xf32>
    %192 = arith.divf %188, %191 : vector<1x256xf32>
    %c0_42 = arith.constant 0 : index
    %c0_43 = arith.constant 0 : index
    %193 = vector.load %arg5[%c0_42, %c0_43] : memref<8x256xf32, #tpu.memory_space<vmem>>, vector<1x256xf32>
    tpu.vector_store %arg5[%c0_42, %c0_43], %192 {strides = array<i32>} : memref<8x256xf32, #tpu.memory_space<vmem>>, vector<1x256xf32>,
    %194 = vector.extract_strided_slice %170 {offsets = [0, 0], sizes = [1, 128], strides = [1, 1]} : vector<1x384xf32> to vector<1x128xf32>
    %195 = arith.addf %185, %194 : vector<1x128xf32>
    %196 = arith.negf %195 : vector<1x128xf32>
    %197 = math.exp %196 : vector<1x128xf32>
    %cst_44 = arith.constant 1.000000e+00 : f32
    %198 = vector.broadcast %cst_44 : f32 to vector<1x128xf32>
    %199 = arith.addf %198, %197 : vector<1x128xf32>
    %200 = arith.divf %198, %199 : vector<1x128xf32>
    %201 = math.tanh %195 : vector<1x128xf32>
    %202 = vector.extract_strided_slice %200 {offsets = [0, 0], sizes = [1, 32], strides = [1, 1]} : vector<1x128xf32> to vector<1x32xf32>
    %203 = vector.extract_strided_slice %200 {offsets = [0, 32], sizes = [1, 32], strides = [1, 1]} : vector<1x128xf32> to vector<1x32xf32>
    %204 = vector.extract_strided_slice %201 {offsets = [0, 64], sizes = [1, 32], strides = [1, 1]} : vector<1x128xf32> to vector<1x32xf32>
    %205 = vector.extract_strided_slice %200 {offsets = [0, 96], sizes = [1, 32], strides = [1, 1]} : vector<1x128xf32> to vector<1x32xf32>
    %206 = arith.mulf %203, %167 : vector<1x32xf32>
    %207 = arith.mulf %202, %204 : vector<1x32xf32>
    %208 = arith.addf %206, %207 : vector<1x32xf32>
    %209 = math.tanh %208 : vector<1x32xf32>
    %210 = arith.mulf %205, %209 : vector<1x32xf32>
    %cst_45 = arith.constant dense<0.000000e+00> : vector<1x384xf32>
    %211 = tpu.matmul %210, %1, %cst_45 {dimension_numbers = #tpu.dot_dimension_numbers<[1], [0], [0], [1], [0, 0, 1, 1], [], []>} : vector<1x32xf32>, vector<32x384xf32>, vector<1x384xf32> -> vector<1x384xf32>
    %212 = vector.extract_strided_slice %211 {offsets = [0, 128], sizes = [1, 256], strides = [1, 1]} : vector<1x384xf32> to vector<1x256xf32>
    %213 = arith.addf %212, %2 : vector<1x256xf32>
    %cst_46 = arith.constant dense<0xFF800000> : vector<1xf32>
    %214 = vector.multi_reduction <maximumf>, %213, %cst_46 [1] : vector<1x256xf32> to vector<1xf32>
    %215 = vector.shape_cast %214 : vector<1xf32> to vector<1x1xf32>
    %216 = vector.broadcast %215 : vector<1x1xf32> to vector<1x256xf32>
    %217 = arith.cmpf oge, %213, %216 : vector<1x256xf32>
    %c255_i32_47 = arith.constant 255 : i32
    %218 = vector.broadcast %c255_i32_47 : i32 to vector<1x256xi32>
    %219 = arith.select %217, %152, %218 : vector<1x256xi1>, vector<1x256xi32>
    %220 = vector.shape_cast %219 : vector<1x256xi32> to vector<1x1x256xi32>
    %cst_48 = arith.constant dense<2147483647> : vector<1xi32>
    %221 = vector.multi_reduction <minsi>, %220, %cst_48 [1, 2] : vector<1x1x256xi32> to vector<1xi32>
    %222 = vector.shape_cast %221 : vector<1xi32> to vector<1x1x1xi32>
    %223 = vector.extract %222[0, 0, 0] : i32 from vector<1x1x1xi32>
    %224 = arith.index_cast %223 : i32 to index
    %c0_49 = arith.constant 0 : index
    %c0_50 = arith.constant 0 : index
    %225 = vector.load %arg1[%224, %c0_49, %c0_50] : memref<256x1x128xf32, #tpu.memory_space<vmem>>, vector<1x1x128xf32>
    %226 = vector.shape_cast %225 : vector<1x1x128xf32> to vector<1x128xf32>
    %227 = vector.broadcast %215 : vector<1x1xf32> to vector<1x256xf32>
    %228 = arith.subf %213, %227 : vector<1x256xf32>
    %229 = math.exp %228 : vector<1x256xf32>
    %cst_51 = arith.constant dense<0.000000e+00> : vector<1xf32>
    %230 = vector.multi_reduction <add>, %229, %cst_51 [1] : vector<1x256xf32> to vector<1xf32>
    %231 = vector.shape_cast %230 : vector<1xf32> to vector<1x1xf32>
    %232 = vector.broadcast %231 : vector<1x1xf32> to vector<1x256xf32>
    %233 = arith.divf %229, %232 : vector<1x256xf32>
    %c1_52 = arith.constant 1 : index
    %c0_53 = arith.constant 0 : index
    %234 = vector.load %arg5[%c1_52, %c0_53] : memref<8x256xf32, #tpu.memory_space<vmem>>, vector<1x256xf32>
    tpu.vector_store %arg5[%c1_52, %c0_53], %233 {strides = array<i32>} : memref<8x256xf32, #tpu.memory_space<vmem>>, vector<1x256xf32>,
    %235 = vector.extract_strided_slice %211 {offsets = [0, 0], sizes = [1, 128], strides = [1, 1]} : vector<1x384xf32> to vector<1x128xf32>
    %236 = arith.addf %226, %235 : vector<1x128xf32>
    %237 = arith.negf %236 : vector<1x128xf32>
    %238 = math.exp %237 : vector<1x128xf32>
    %cst_54 = arith.constant 1.000000e+00 : f32
    %239 = vector.broadcast %cst_54 : f32 to vector<1x128xf32>
    %240 = arith.addf %239, %238 : vector<1x128xf32>
    %241 = arith.divf %239, %240 : vector<1x128xf32>
    %242 = math.tanh %236 : vector<1x128xf32>
    %243 = vector.extract_strided_slice %241 {offsets = [0, 0], sizes = [1, 32], strides = [1, 1]} : vector<1x128xf32> to vector<1x32xf32>
    %244 = vector.extract_strided_slice %241 {offsets = [0, 32], sizes = [1, 32], strides = [1, 1]} : vector<1x128xf32> to vector<1x32xf32>
    %245 = vector.extract_strided_slice %242 {offsets = [0, 64], sizes = [1, 32], strides = [1, 1]} : vector<1x128xf32> to vector<1x32xf32>
    %246 = vector.extract_strided_slice %241 {offsets = [0, 96], sizes = [1, 32], strides = [1, 1]} : vector<1x128xf32> to vector<1x32xf32>
    %247 = arith.mulf %244, %208 : vector<1x32xf32>
    %248 = arith.mulf %243, %245 : vector<1x32xf32>
    %249 = arith.addf %247, %248 : vector<1x32xf32>
    %250 = math.tanh %249 : vector<1x32xf32>
    %251 = arith.mulf %246, %250 : vector<1x32xf32>
    %cst_55 = arith.constant dense<0.000000e+00> : vector<1x384xf32>
    %252 = tpu.matmul %251, %1, %cst_55 {dimension_numbers = #tpu.dot_dimension_numbers<[1], [0], [0], [1], [0, 0, 1, 1], [], []>} : vector<1x32xf32>, vector<32x384xf32>, vector<1x384xf32> -> vector<1x384xf32>
    %253 = vector.extract_strided_slice %252 {offsets = [0, 128], sizes = [1, 256], strides = [1, 1]} : vector<1x384xf32> to vector<1x256xf32>
    %254 = arith.addf %253, %2 : vector<1x256xf32>
    %cst_56 = arith.constant dense<0xFF800000> : vector<1xf32>
    %255 = vector.multi_reduction <maximumf>, %254, %cst_56 [1] : vector<1x256xf32> to vector<1xf32>
    %256 = vector.shape_cast %255 : vector<1xf32> to vector<1x1xf32>
    %257 = vector.broadcast %256 : vector<1x1xf32> to vector<1x256xf32>
    %258 = arith.cmpf oge, %254, %257 : vector<1x256xf32>
    %c255_i32_57 = arith.constant 255 : i32
    %259 = vector.broadcast %c255_i32_57 : i32 to vector<1x256xi32>
    %260 = arith.select %258, %152, %259 : vector<1x256xi1>, vector<1x256xi32>
    %261 = vector.shape_cast %260 : vector<1x256xi32> to vector<1x1x256xi32>
    %cst_58 = arith.constant dense<2147483647> : vector<1xi32>
    %262 = vector.multi_reduction <minsi>, %261, %cst_58 [1, 2] : vector<1x1x256xi32> to vector<1xi32>
    %263 = vector.shape_cast %262 : vector<1xi32> to vector<1x1x1xi32>
    %264 = vector.extract %263[0, 0, 0] : i32 from vector<1x1x1xi32>
    %265 = arith.index_cast %264 : i32 to index
    %c0_59 = arith.constant 0 : index
    %c0_60 = arith.constant 0 : index
    %266 = vector.load %arg1[%265, %c0_59, %c0_60] : memref<256x1x128xf32, #tpu.memory_space<vmem>>, vector<1x1x128xf32>
    %267 = vector.shape_cast %266 : vector<1x1x128xf32> to vector<1x128xf32>
    %268 = vector.broadcast %256 : vector<1x1xf32> to vector<1x256xf32>
    %269 = arith.subf %254, %268 : vector<1x256xf32>
    %270 = math.exp %269 : vector<1x256xf32>
    %cst_61 = arith.constant dense<0.000000e+00> : vector<1xf32>
    %271 = vector.multi_reduction <add>, %270, %cst_61 [1] : vector<1x256xf32> to vector<1xf32>
    %272 = vector.shape_cast %271 : vector<1xf32> to vector<1x1xf32>
    %273 = vector.broadcast %272 : vector<1x1xf32> to vector<1x256xf32>
    %274 = arith.divf %270, %273 : vector<1x256xf32>
    %c2_62 = arith.constant 2 : index
    %c0_63 = arith.constant 0 : index
    %275 = vector.load %arg5[%c2_62, %c0_63] : memref<8x256xf32, #tpu.memory_space<vmem>>, vector<1x256xf32>
    tpu.vector_store %arg5[%c2_62, %c0_63], %274 {strides = array<i32>} : memref<8x256xf32, #tpu.memory_space<vmem>>, vector<1x256xf32>,
    %276 = vector.extract_strided_slice %252 {offsets = [0, 0], sizes = [1, 128], strides = [1, 1]} : vector<1x384xf32> to vector<1x128xf32>
    %277 = arith.addf %267, %276 : vector<1x128xf32>
    %278 = arith.negf %277 : vector<1x128xf32>
    %279 = math.exp %278 : vector<1x128xf32>
    %cst_64 = arith.constant 1.000000e+00 : f32
    %280 = vector.broadcast %cst_64 : f32 to vector<1x128xf32>
    %281 = arith.addf %280, %279 : vector<1x128xf32>
    %282 = arith.divf %280, %281 : vector<1x128xf32>
    %283 = math.tanh %277 : vector<1x128xf32>
    %284 = vector.extract_strided_slice %282 {offsets = [0, 0], sizes = [1, 32], strides = [1, 1]} : vector<1x128xf32> to vector<1x32xf32>
    %285 = vector.extract_strided_slice %282 {offsets = [0, 32], sizes = [1, 32], strides = [1, 1]} : vector<1x128xf32> to vector<1x32xf32>
    %286 = vector.extract_strided_slice %283 {offsets = [0, 64], sizes = [1, 32], strides = [1, 1]} : vector<1x128xf32> to vector<1x32xf32>
    %287 = vector.extract_strided_slice %282 {offsets = [0, 96], sizes = [1, 32], strides = [1, 1]} : vector<1x128xf32> to vector<1x32xf32>
    %288 = arith.mulf %285, %249 : vector<1x32xf32>
    %289 = arith.mulf %284, %286 : vector<1x32xf32>
    %290 = arith.addf %288, %289 : vector<1x32xf32>
    %291 = math.tanh %290 : vector<1x32xf32>
    %292 = arith.mulf %287, %291 : vector<1x32xf32>
    %cst_65 = arith.constant dense<0.000000e+00> : vector<1x384xf32>
    %293 = tpu.matmul %292, %1, %cst_65 {dimension_numbers = #tpu.dot_dimension_numbers<[1], [0], [0], [1], [0, 0, 1, 1], [], []>} : vector<1x32xf32>, vector<32x384xf32>, vector<1x384xf32> -> vector<1x384xf32>
    %294 = vector.extract_strided_slice %293 {offsets = [0, 128], sizes = [1, 256], strides = [1, 1]} : vector<1x384xf32> to vector<1x256xf32>
    %295 = arith.addf %294, %2 : vector<1x256xf32>
    %cst_66 = arith.constant dense<0xFF800000> : vector<1xf32>
    %296 = vector.multi_reduction <maximumf>, %295, %cst_66 [1] : vector<1x256xf32> to vector<1xf32>
    %297 = vector.shape_cast %296 : vector<1xf32> to vector<1x1xf32>
    %298 = vector.broadcast %297 : vector<1x1xf32> to vector<1x256xf32>
    %299 = arith.cmpf oge, %295, %298 : vector<1x256xf32>
    %c255_i32_67 = arith.constant 255 : i32
    %300 = vector.broadcast %c255_i32_67 : i32 to vector<1x256xi32>
    %301 = arith.select %299, %152, %300 : vector<1x256xi1>, vector<1x256xi32>
    %302 = vector.shape_cast %301 : vector<1x256xi32> to vector<1x1x256xi32>
    %cst_68 = arith.constant dense<2147483647> : vector<1xi32>
    %303 = vector.multi_reduction <minsi>, %302, %cst_68 [1, 2] : vector<1x1x256xi32> to vector<1xi32>
    %304 = vector.shape_cast %303 : vector<1xi32> to vector<1x1x1xi32>
    %305 = vector.extract %304[0, 0, 0] : i32 from vector<1x1x1xi32>
    %306 = arith.index_cast %305 : i32 to index
    %c0_69 = arith.constant 0 : index
    %c0_70 = arith.constant 0 : index
    %307 = vector.load %arg1[%306, %c0_69, %c0_70] : memref<256x1x128xf32, #tpu.memory_space<vmem>>, vector<1x1x128xf32>
    %308 = vector.shape_cast %307 : vector<1x1x128xf32> to vector<1x128xf32>
    %309 = vector.broadcast %297 : vector<1x1xf32> to vector<1x256xf32>
    %310 = arith.subf %295, %309 : vector<1x256xf32>
    %311 = math.exp %310 : vector<1x256xf32>
    %cst_71 = arith.constant dense<0.000000e+00> : vector<1xf32>
    %312 = vector.multi_reduction <add>, %311, %cst_71 [1] : vector<1x256xf32> to vector<1xf32>
    %313 = vector.shape_cast %312 : vector<1xf32> to vector<1x1xf32>
    %314 = vector.broadcast %313 : vector<1x1xf32> to vector<1x256xf32>
    %315 = arith.divf %311, %314 : vector<1x256xf32>
    %c3_72 = arith.constant 3 : index
    %c0_73 = arith.constant 0 : index
    %316 = vector.load %arg5[%c3_72, %c0_73] : memref<8x256xf32, #tpu.memory_space<vmem>>, vector<1x256xf32>
    tpu.vector_store %arg5[%c3_72, %c0_73], %315 {strides = array<i32>} : memref<8x256xf32, #tpu.memory_space<vmem>>, vector<1x256xf32>,
    %317 = vector.extract_strided_slice %293 {offsets = [0, 0], sizes = [1, 128], strides = [1, 1]} : vector<1x384xf32> to vector<1x128xf32>
    %318 = arith.addf %308, %317 : vector<1x128xf32>
    %319 = arith.negf %318 : vector<1x128xf32>
    %320 = math.exp %319 : vector<1x128xf32>
    %cst_74 = arith.constant 1.000000e+00 : f32
    %321 = vector.broadcast %cst_74 : f32 to vector<1x128xf32>
    %322 = arith.addf %321, %320 : vector<1x128xf32>
    %323 = arith.divf %321, %322 : vector<1x128xf32>
    %324 = math.tanh %318 : vector<1x128xf32>
    %325 = vector.extract_strided_slice %323 {offsets = [0, 0], sizes = [1, 32], strides = [1, 1]} : vector<1x128xf32> to vector<1x32xf32>
    %326 = vector.extract_strided_slice %323 {offsets = [0, 32], sizes = [1, 32], strides = [1, 1]} : vector<1x128xf32> to vector<1x32xf32>
    %327 = vector.extract_strided_slice %324 {offsets = [0, 64], sizes = [1, 32], strides = [1, 1]} : vector<1x128xf32> to vector<1x32xf32>
    %328 = vector.extract_strided_slice %323 {offsets = [0, 96], sizes = [1, 32], strides = [1, 1]} : vector<1x128xf32> to vector<1x32xf32>
    %329 = arith.mulf %326, %290 : vector<1x32xf32>
    %330 = arith.mulf %325, %327 : vector<1x32xf32>
    %331 = arith.addf %329, %330 : vector<1x32xf32>
    %332 = math.tanh %331 : vector<1x32xf32>
    %333 = arith.mulf %328, %332 : vector<1x32xf32>
    %cst_75 = arith.constant dense<0.000000e+00> : vector<1x384xf32>
    %334 = tpu.matmul %333, %1, %cst_75 {dimension_numbers = #tpu.dot_dimension_numbers<[1], [0], [0], [1], [0, 0, 1, 1], [], []>} : vector<1x32xf32>, vector<32x384xf32>, vector<1x384xf32> -> vector<1x384xf32>
    %335 = vector.extract_strided_slice %334 {offsets = [0, 128], sizes = [1, 256], strides = [1, 1]} : vector<1x384xf32> to vector<1x256xf32>
    %336 = arith.addf %335, %2 : vector<1x256xf32>
    %cst_76 = arith.constant dense<0xFF800000> : vector<1xf32>
    %337 = vector.multi_reduction <maximumf>, %336, %cst_76 [1] : vector<1x256xf32> to vector<1xf32>
    %338 = vector.shape_cast %337 : vector<1xf32> to vector<1x1xf32>
    %339 = vector.broadcast %338 : vector<1x1xf32> to vector<1x256xf32>
    %340 = arith.cmpf oge, %336, %339 : vector<1x256xf32>
    %c255_i32_77 = arith.constant 255 : i32
    %341 = vector.broadcast %c255_i32_77 : i32 to vector<1x256xi32>
    %342 = arith.select %340, %152, %341 : vector<1x256xi1>, vector<1x256xi32>
    %343 = vector.shape_cast %342 : vector<1x256xi32> to vector<1x1x256xi32>
    %cst_78 = arith.constant dense<2147483647> : vector<1xi32>
    %344 = vector.multi_reduction <minsi>, %343, %cst_78 [1, 2] : vector<1x1x256xi32> to vector<1xi32>
    %345 = vector.shape_cast %344 : vector<1xi32> to vector<1x1x1xi32>
    %346 = vector.extract %345[0, 0, 0] : i32 from vector<1x1x1xi32>
    %347 = arith.index_cast %346 : i32 to index
    %c0_79 = arith.constant 0 : index
    %c0_80 = arith.constant 0 : index
    %348 = vector.load %arg1[%347, %c0_79, %c0_80] : memref<256x1x128xf32, #tpu.memory_space<vmem>>, vector<1x1x128xf32>
    %349 = vector.shape_cast %348 : vector<1x1x128xf32> to vector<1x128xf32>
    %350 = vector.broadcast %338 : vector<1x1xf32> to vector<1x256xf32>
    %351 = arith.subf %336, %350 : vector<1x256xf32>
    %352 = math.exp %351 : vector<1x256xf32>
    %cst_81 = arith.constant dense<0.000000e+00> : vector<1xf32>
    %353 = vector.multi_reduction <add>, %352, %cst_81 [1] : vector<1x256xf32> to vector<1xf32>
    %354 = vector.shape_cast %353 : vector<1xf32> to vector<1x1xf32>
    %355 = vector.broadcast %354 : vector<1x1xf32> to vector<1x256xf32>
    %356 = arith.divf %352, %355 : vector<1x256xf32>
    %c4_82 = arith.constant 4 : index
    %c0_83 = arith.constant 0 : index
    %357 = vector.load %arg5[%c4_82, %c0_83] : memref<8x256xf32, #tpu.memory_space<vmem>>, vector<1x256xf32>
    tpu.vector_store %arg5[%c4_82, %c0_83], %356 {strides = array<i32>} : memref<8x256xf32, #tpu.memory_space<vmem>>, vector<1x256xf32>,
    %358 = vector.extract_strided_slice %334 {offsets = [0, 0], sizes = [1, 128], strides = [1, 1]} : vector<1x384xf32> to vector<1x128xf32>
    %359 = arith.addf %349, %358 : vector<1x128xf32>
    %360 = arith.negf %359 : vector<1x128xf32>
    %361 = math.exp %360 : vector<1x128xf32>
    %cst_84 = arith.constant 1.000000e+00 : f32
    %362 = vector.broadcast %cst_84 : f32 to vector<1x128xf32>
    %363 = arith.addf %362, %361 : vector<1x128xf32>
    %364 = arith.divf %362, %363 : vector<1x128xf32>
    %365 = math.tanh %359 : vector<1x128xf32>
    %366 = vector.extract_strided_slice %364 {offsets = [0, 0], sizes = [1, 32], strides = [1, 1]} : vector<1x128xf32> to vector<1x32xf32>
    %367 = vector.extract_strided_slice %364 {offsets = [0, 32], sizes = [1, 32], strides = [1, 1]} : vector<1x128xf32> to vector<1x32xf32>
    %368 = vector.extract_strided_slice %365 {offsets = [0, 64], sizes = [1, 32], strides = [1, 1]} : vector<1x128xf32> to vector<1x32xf32>
    %369 = vector.extract_strided_slice %364 {offsets = [0, 96], sizes = [1, 32], strides = [1, 1]} : vector<1x128xf32> to vector<1x32xf32>
    %370 = arith.mulf %367, %331 : vector<1x32xf32>
    %371 = arith.mulf %366, %368 : vector<1x32xf32>
    %372 = arith.addf %370, %371 : vector<1x32xf32>
    %373 = math.tanh %372 : vector<1x32xf32>
    %374 = arith.mulf %369, %373 : vector<1x32xf32>
    %cst_85 = arith.constant dense<0.000000e+00> : vector<1x384xf32>
    %375 = tpu.matmul %374, %1, %cst_85 {dimension_numbers = #tpu.dot_dimension_numbers<[1], [0], [0], [1], [0, 0, 1, 1], [], []>} : vector<1x32xf32>, vector<32x384xf32>, vector<1x384xf32> -> vector<1x384xf32>
    %376 = vector.extract_strided_slice %375 {offsets = [0, 128], sizes = [1, 256], strides = [1, 1]} : vector<1x384xf32> to vector<1x256xf32>
    %377 = arith.addf %376, %2 : vector<1x256xf32>
    %cst_86 = arith.constant dense<0xFF800000> : vector<1xf32>
    %378 = vector.multi_reduction <maximumf>, %377, %cst_86 [1] : vector<1x256xf32> to vector<1xf32>
    %379 = vector.shape_cast %378 : vector<1xf32> to vector<1x1xf32>
    %380 = vector.broadcast %379 : vector<1x1xf32> to vector<1x256xf32>
    %381 = arith.cmpf oge, %377, %380 : vector<1x256xf32>
    %c255_i32_87 = arith.constant 255 : i32
    %382 = vector.broadcast %c255_i32_87 : i32 to vector<1x256xi32>
    %383 = arith.select %381, %152, %382 : vector<1x256xi1>, vector<1x256xi32>
    %384 = vector.shape_cast %383 : vector<1x256xi32> to vector<1x1x256xi32>
    %cst_88 = arith.constant dense<2147483647> : vector<1xi32>
    %385 = vector.multi_reduction <minsi>, %384, %cst_88 [1, 2] : vector<1x1x256xi32> to vector<1xi32>
    %386 = vector.shape_cast %385 : vector<1xi32> to vector<1x1x1xi32>
    %387 = vector.extract %386[0, 0, 0] : i32 from vector<1x1x1xi32>
    %388 = arith.index_cast %387 : i32 to index
    %c0_89 = arith.constant 0 : index
    %c0_90 = arith.constant 0 : index
    %389 = vector.load %arg1[%388, %c0_89, %c0_90] : memref<256x1x128xf32, #tpu.memory_space<vmem>>, vector<1x1x128xf32>
    %390 = vector.shape_cast %389 : vector<1x1x128xf32> to vector<1x128xf32>
    %391 = vector.broadcast %379 : vector<1x1xf32> to vector<1x256xf32>
    %392 = arith.subf %377, %391 : vector<1x256xf32>
    %393 = math.exp %392 : vector<1x256xf32>
    %cst_91 = arith.constant dense<0.000000e+00> : vector<1xf32>
    %394 = vector.multi_reduction <add>, %393, %cst_91 [1] : vector<1x256xf32> to vector<1xf32>
    %395 = vector.shape_cast %394 : vector<1xf32> to vector<1x1xf32>
    %396 = vector.broadcast %395 : vector<1x1xf32> to vector<1x256xf32>
    %397 = arith.divf %393, %396 : vector<1x256xf32>
    %c5_92 = arith.constant 5 : index
    %c0_93 = arith.constant 0 : index
    %398 = vector.load %arg5[%c5_92, %c0_93] : memref<8x256xf32, #tpu.memory_space<vmem>>, vector<1x256xf32>
    tpu.vector_store %arg5[%c5_92, %c0_93], %397 {strides = array<i32>} : memref<8x256xf32, #tpu.memory_space<vmem>>, vector<1x256xf32>,
    %399 = vector.extract_strided_slice %375 {offsets = [0, 0], sizes = [1, 128], strides = [1, 1]} : vector<1x384xf32> to vector<1x128xf32>
    %400 = arith.addf %390, %399 : vector<1x128xf32>
    %401 = arith.negf %400 : vector<1x128xf32>
    %402 = math.exp %401 : vector<1x128xf32>
    %cst_94 = arith.constant 1.000000e+00 : f32
    %403 = vector.broadcast %cst_94 : f32 to vector<1x128xf32>
    %404 = arith.addf %403, %402 : vector<1x128xf32>
    %405 = arith.divf %403, %404 : vector<1x128xf32>
    %406 = math.tanh %400 : vector<1x128xf32>
    %407 = vector.extract_strided_slice %405 {offsets = [0, 0], sizes = [1, 32], strides = [1, 1]} : vector<1x128xf32> to vector<1x32xf32>
    %408 = vector.extract_strided_slice %405 {offsets = [0, 32], sizes = [1, 32], strides = [1, 1]} : vector<1x128xf32> to vector<1x32xf32>
    %409 = vector.extract_strided_slice %406 {offsets = [0, 64], sizes = [1, 32], strides = [1, 1]} : vector<1x128xf32> to vector<1x32xf32>
    %410 = vector.extract_strided_slice %405 {offsets = [0, 96], sizes = [1, 32], strides = [1, 1]} : vector<1x128xf32> to vector<1x32xf32>
    %411 = arith.mulf %408, %372 : vector<1x32xf32>
    %412 = arith.mulf %407, %409 : vector<1x32xf32>
    %413 = arith.addf %411, %412 : vector<1x32xf32>
    %414 = math.tanh %413 : vector<1x32xf32>
    %415 = arith.mulf %410, %414 : vector<1x32xf32>
    %cst_95 = arith.constant dense<0.000000e+00> : vector<1x384xf32>
    %416 = tpu.matmul %415, %1, %cst_95 {dimension_numbers = #tpu.dot_dimension_numbers<[1], [0], [0], [1], [0, 0, 1, 1], [], []>} : vector<1x32xf32>, vector<32x384xf32>, vector<1x384xf32> -> vector<1x384xf32>
    %417 = vector.extract_strided_slice %416 {offsets = [0, 128], sizes = [1, 256], strides = [1, 1]} : vector<1x384xf32> to vector<1x256xf32>
    %418 = arith.addf %417, %2 : vector<1x256xf32>
    %cst_96 = arith.constant dense<0xFF800000> : vector<1xf32>
    %419 = vector.multi_reduction <maximumf>, %418, %cst_96 [1] : vector<1x256xf32> to vector<1xf32>
    %420 = vector.shape_cast %419 : vector<1xf32> to vector<1x1xf32>
    %421 = vector.broadcast %420 : vector<1x1xf32> to vector<1x256xf32>
    %422 = arith.cmpf oge, %418, %421 : vector<1x256xf32>
    %c255_i32_97 = arith.constant 255 : i32
    %423 = vector.broadcast %c255_i32_97 : i32 to vector<1x256xi32>
    %424 = arith.select %422, %152, %423 : vector<1x256xi1>, vector<1x256xi32>
    %425 = vector.shape_cast %424 : vector<1x256xi32> to vector<1x1x256xi32>
    %cst_98 = arith.constant dense<2147483647> : vector<1xi32>
    %426 = vector.multi_reduction <minsi>, %425, %cst_98 [1, 2] : vector<1x1x256xi32> to vector<1xi32>
    %427 = vector.shape_cast %426 : vector<1xi32> to vector<1x1x1xi32>
    %428 = vector.extract %427[0, 0, 0] : i32 from vector<1x1x1xi32>
    %429 = arith.index_cast %428 : i32 to index
    %c0_99 = arith.constant 0 : index
    %c0_100 = arith.constant 0 : index
    %430 = vector.load %arg1[%429, %c0_99, %c0_100] : memref<256x1x128xf32, #tpu.memory_space<vmem>>, vector<1x1x128xf32>
    %431 = vector.shape_cast %430 : vector<1x1x128xf32> to vector<1x128xf32>
    %432 = vector.broadcast %420 : vector<1x1xf32> to vector<1x256xf32>
    %433 = arith.subf %418, %432 : vector<1x256xf32>
    %434 = math.exp %433 : vector<1x256xf32>
    %cst_101 = arith.constant dense<0.000000e+00> : vector<1xf32>
    %435 = vector.multi_reduction <add>, %434, %cst_101 [1] : vector<1x256xf32> to vector<1xf32>
    %436 = vector.shape_cast %435 : vector<1xf32> to vector<1x1xf32>
    %437 = vector.broadcast %436 : vector<1x1xf32> to vector<1x256xf32>
    %438 = arith.divf %434, %437 : vector<1x256xf32>
    %c6_102 = arith.constant 6 : index
    %c0_103 = arith.constant 0 : index
    %439 = vector.load %arg5[%c6_102, %c0_103] : memref<8x256xf32, #tpu.memory_space<vmem>>, vector<1x256xf32>
    tpu.vector_store %arg5[%c6_102, %c0_103], %438 {strides = array<i32>} : memref<8x256xf32, #tpu.memory_space<vmem>>, vector<1x256xf32>,
    %440 = vector.extract_strided_slice %416 {offsets = [0, 0], sizes = [1, 128], strides = [1, 1]} : vector<1x384xf32> to vector<1x128xf32>
    %441 = arith.addf %431, %440 : vector<1x128xf32>
    %442 = arith.negf %441 : vector<1x128xf32>
    %443 = math.exp %442 : vector<1x128xf32>
    %cst_104 = arith.constant 1.000000e+00 : f32
    %444 = vector.broadcast %cst_104 : f32 to vector<1x128xf32>
    %445 = arith.addf %444, %443 : vector<1x128xf32>
    %446 = arith.divf %444, %445 : vector<1x128xf32>
    %447 = math.tanh %441 : vector<1x128xf32>
    %448 = vector.extract_strided_slice %446 {offsets = [0, 0], sizes = [1, 32], strides = [1, 1]} : vector<1x128xf32> to vector<1x32xf32>
    %449 = vector.extract_strided_slice %446 {offsets = [0, 32], sizes = [1, 32], strides = [1, 1]} : vector<1x128xf32> to vector<1x32xf32>
    %450 = vector.extract_strided_slice %447 {offsets = [0, 64], sizes = [1, 32], strides = [1, 1]} : vector<1x128xf32> to vector<1x32xf32>
    %451 = vector.extract_strided_slice %446 {offsets = [0, 96], sizes = [1, 32], strides = [1, 1]} : vector<1x128xf32> to vector<1x32xf32>
    %452 = arith.mulf %449, %413 : vector<1x32xf32>
    %453 = arith.mulf %448, %450 : vector<1x32xf32>
    %454 = arith.addf %452, %453 : vector<1x32xf32>
    %455 = math.tanh %454 : vector<1x32xf32>
    %456 = arith.mulf %451, %455 : vector<1x32xf32>
    %cst_105 = arith.constant dense<0.000000e+00> : vector<1x384xf32>
    %457 = tpu.matmul %456, %1, %cst_105 {dimension_numbers = #tpu.dot_dimension_numbers<[1], [0], [0], [1], [0, 0, 1, 1], [], []>} : vector<1x32xf32>, vector<32x384xf32>, vector<1x384xf32> -> vector<1x384xf32>
    %458 = vector.extract_strided_slice %457 {offsets = [0, 128], sizes = [1, 256], strides = [1, 1]} : vector<1x384xf32> to vector<1x256xf32>
    %459 = arith.addf %458, %2 : vector<1x256xf32>
    %cst_106 = arith.constant dense<0xFF800000> : vector<1xf32>
    %460 = vector.multi_reduction <maximumf>, %459, %cst_106 [1] : vector<1x256xf32> to vector<1xf32>
    %461 = vector.shape_cast %460 : vector<1xf32> to vector<1x1xf32>
    %462 = vector.broadcast %461 : vector<1x1xf32> to vector<1x256xf32>
    %463 = arith.subf %459, %462 : vector<1x256xf32>
    %464 = math.exp %463 : vector<1x256xf32>
    %cst_107 = arith.constant dense<0.000000e+00> : vector<1xf32>
    %465 = vector.multi_reduction <add>, %464, %cst_107 [1] : vector<1x256xf32> to vector<1xf32>
    %466 = vector.shape_cast %465 : vector<1xf32> to vector<1x1xf32>
    %467 = vector.broadcast %466 : vector<1x1xf32> to vector<1x256xf32>
    %468 = arith.divf %464, %467 : vector<1x256xf32>
    %c7_108 = arith.constant 7 : index
    %c0_109 = arith.constant 0 : index
    %469 = vector.load %arg5[%c7_108, %c0_109] : memref<8x256xf32, #tpu.memory_space<vmem>>, vector<1x256xf32>
    tpu.vector_store %arg5[%c7_108, %c0_109], %468 {strides = array<i32>} : memref<8x256xf32, #tpu.memory_space<vmem>>, vector<1x256xf32>,
    return
  }
}

</mosaic_0001>

<bundles_post_ra>
// kernel: tpu_custom_call.1
= control target key start
LH: loop header
LB: loop body
LE: loop exit
PB: predicated region body
PF: predicated region fallthrough
CT: control target
= control target key end

     0   :  { %10 = vsyncpa [#allocation3], 0  ;;  %s4416_s0 = inlined_call_operand.hbm [shape: f32[8,128], index: 0, kind: input, shape index: {}]   ;;  %s4417_s1 = inlined_call_operand.hbm [shape: f32[256,1,128], index: 1, kind: input, shape index: {}]   ;;  %s4418_s2 = inlined_call_operand.hbm [shape: f32[32,128], index: 2, kind: input, shape index: {}]   ;;  %s4419_s3 = inlined_call_operand.hbm [shape: f32[32,384], index: 3, kind: input, shape index: {}]   ;;  %s4420_s4 = inlined_call_operand.vmem [shape: f32[1,256], index: 4, kind: input, shape index: {}]   ;;  %s4421_s5 = inlined_call_operand.hbm [shape: f32[8,256], index: 5, kind: output, shape index: {}]  }
   0x1   :  { %11 = vsyncpa [#allocation6], 0 }
   0x2   :  { %12 = vsyncpa [#allocation9], 0 }
   0x3   :  { %13 = vsyncpa [#allocation4], 0  ;;  %s3778_s18 = smov [#allocation5]   ;;  %s3660_s22 = scalar_lea.hbm %s4417_s1, 4096 }
   0x4   :  { %s29_s19 = sshll.u32 %s3778_s18, 4  ;;  %p3661_p0 = scmp.ne.s32.totalorder %s4417_s1, %s3660_s22  ;;  %s30_s19 = int_to_ptr.vmem [resolvable:$true] %s29_s19 }
   0x5   :  { %p3664_p1 = scmp.lt.u32.totalorder %s3660_s22, %s4417_s1 }
   0x7   :  { %p3666_p2 = pnand %p3664_p1, %p3661_p0 }
   0x9   :  { %3669 = shalt.err (!%p3666_p2)
}
   0xa   :  { %s3670_s27 = scalar_lea.vmem %s30_s19, 4096  ;;  %p3675_p4 = scmp.lt.s32.totalorder %s30_s19, %s30_s19 }
   0xb   :  { %p3671_p3 = scmp.ne.s32.totalorder %s30_s19, %s3670_s27  ;;  %p3676_p5 = scmp.lt.s32.totalorder %s3670_s27, %s3670_s27 }
   0xd   :  { %p3677_p6 = por %p3676_p5, %p3675_p4 }
   0xf   :  { %p3678_p7 = pnand %p3677_p6, %p3671_p3 }
  0x11   :  { %3681 = shalt.err (!%p3678_p7)
}
  0x12   :  { %s3779_s28 = smov 16   ;;  %s3780_s29 = smov 1  }
  0x13   :  { %35 = dma.hbm_to_vmem [thread:$0]  %s4417_s1, 4096, %s30_s19, [#allocation6], %s3779_s28, %s3779_s28, %s3780_s29  }
  0x14   :  { %s3781_s7 = smov [#allocation2]   ;;  %s3782_s9 = smov [#allocation7]  }
  0x15   :  { %s20_s8 = sshll.u32 %s3781_s7, 4  ;;  %s41_s10 = sshll.u32 %s3782_s9, 4  ;;  %s21_s8 = int_to_ptr.vmem [resolvable:$true] %s20_s8  ;;  %s42_s10 = int_to_ptr.vmem [resolvable:$true] %s41_s10 }
  0x16   :  { %s3682_s13 = scalar_lea.hbm %s4416_s0, 128 }
  0x17   :  { %p3683_p8 = scmp.ne.s32.totalorder %s4416_s0, %s3682_s13  ;;  %p3686_p9 = scmp.lt.u32.totalorder %s3682_s13, %s4416_s0 }
  0x19   :  { %p3688_p10 = pnand %p3686_p9, %p3683_p8 }
  0x1b   :  { %3691 = shalt.err (!%p3688_p10)
}
  0x1c   :  { %s3692_s1 = scalar_lea.vmem %s21_s8, 128  ;;  %p3697_p12 = scmp.lt.s32.totalorder %s21_s8, %s21_s8 }
  0x1d   :  { %p3693_p11 = scmp.ne.s32.totalorder %s21_s8, %s3692_s1  ;;  %p3698_p13 = scmp.lt.s32.totalorder %s3692_s1, %s3692_s1 }
  0x1f   :  { %p3699_p0 = por %p3698_p13, %p3697_p12 }
  0x21   :  { %p3700_p1 = pnand %p3699_p0, %p3693_p11 }
  0x23   :  { %3703 = shalt.err (!%p3700_p1)
}
  0x24   :  { %23 = dma.hbm_to_vmem [thread:$0]  %s4416_s0, 128, %s21_s8, [#allocation3]  }
  0x25   :  { %s3704_s22 = scalar_lea.hbm %s4418_s2, 512 }
  0x26   :  { %p3705_p2 = scmp.ne.s32.totalorder %s4418_s2, %s3704_s22  ;;  %p3708_p3 = scmp.lt.u32.totalorder %s3704_s22, %s4418_s2 }
  0x28   :  { %p3710_p4 = pnand %p3708_p3, %p3705_p2 }
  0x2a   :  { %3713 = shalt.err (!%p3710_p4)
}
  0x2b   :  { %s3714_s27 = scalar_lea.vmem %s42_s10, 512  ;;  %p3719_p6 = scmp.lt.s32.totalorder %s42_s10, %s42_s10 }
  0x2c   :  { %p3715_p5 = scmp.ne.s32.totalorder %s42_s10, %s3714_s27  ;;  %p3720_p7 = scmp.lt.s32.totalorder %s3714_s27, %s3714_s27 }
  0x2e   :  { %p3721_p8 = por %p3720_p7, %p3719_p6 }
  0x30   :  { %p3722_p9 = pnand %p3721_p8, %p3715_p5 }
  0x32   :  { %3725 = shalt.err (!%p3722_p9)
}
  0x33   :  { %s3783_s0 = smov 128   ;;  %s3784_s28 = smov 8  }
  0x34   :  { %47 = dma.hbm_to_vmem [thread:$0]  %s4418_s2, 512, %s42_s10, [#allocation6], %s3783_s0, %s3783_s0, %s3784_s28  }
  0x35   :  { %s3785_s6 = smov [#allocation8]   ;;  %s3726_s11 = scalar_lea.hbm %s4419_s3, 1536 }
  0x36   :  { %s53_s7 = sshll.u32 %s3785_s6, 4  ;;  %p3727_p10 = scmp.ne.s32.totalorder %s4419_s3, %s3726_s11  ;;  %s54_s7 = int_to_ptr.vmem [resolvable:$true] %s53_s7 }
  0x37   :  { %p3730_p11 = scmp.lt.u32.totalorder %s3726_s11, %s4419_s3 }
  0x39   :  { %p3732_p12 = pnand %p3730_p11, %p3727_p10 }
  0x3b   :  { %3735 = shalt.err (!%p3732_p12)
}
  0x3c   :  { %s3736_s16 = scalar_lea.vmem %s54_s7, 1536  ;;  %p3741_p0 = scmp.lt.s32.totalorder %s54_s7, %s54_s7 }
  0x3d   :  { %p3737_p13 = scmp.ne.s32.totalorder %s54_s7, %s3736_s16  ;;  %p3742_p1 = scmp.lt.s32.totalorder %s3736_s16, %s3736_s16 }
  0x3f   :  { %p3743_p2 = por %p3742_p1, %p3741_p0 }
  0x41   :  { %p3744_p3 = pnand %p3743_p2, %p3737_p13 }
  0x43   :  { %3747 = shalt.err (!%p3744_p3)
}
  0x44   :  { %s3786_s2 = smov 384   ;;  %s3787_s10 = smov 24  }
  0x45   :  { %59 = dma.hbm_to_vmem [thread:$0]  %s4419_s3, 1536, %s54_s7, [#allocation9], %s3786_s2, %s3786_s2, %s3787_s10  }
  0x46   :  { %3770 = dma.done.wait [#allocation3], 128  }
  0x47   :  { %3771 = vsyncadd [#allocation3], 4294967168 }
  0x48   :  { %3772 = dma.done.wait [#allocation6], 4608  }
  0x49   :  { %3773 = vsyncadd [#allocation6], 4294962688 }
  0x4a   :  { %3774 = dma.done.wait [#allocation9], 1536  }
  0x4b   :  { %3775 = vsyncadd [#allocation9], 4294965760  ;;  %v3788_v0 = vmov 0.0|0.0   ;;  %vm3789_vm0 = vmmov 0   ;;  %v3790_v1 = vmov 0.0   ;;  %v74_v2 = vld [vmem:[#allocation7] sm:$0xff] }
  0x4c   :  { %3285 = vmatprep.subr.bf16.mxu0 %v3788_v0  ;;  %3117 = vmatprep.mubr.msk.f32.mxu0 %vm3789_vm0, %v3790_v1  ;;  %v75_v3 = vld [vmem:[#allocation7 + $0x8] sm:$0xff]  ;;  %v76_v4 = vld [vmem:[#allocation7 + $0x10] sm:$0xff]  ;;  %v77_v6 = vld [vmem:[#allocation7 + $0x18] sm:$0xff]  ;;  %s3791_s3 = smov 64   ;;  %s3792_s18 = smov 32   ;;  %vm92_vm1 = vcmask 261120  }
  0x4d   :  { %3291 = vmatprep.subr.bf16.mxu1 %v3788_v0  ;;  %3128 = vmatprep.mubr.msk.f32.mxu1 %vm3789_vm0, %v3790_v1  ;;  %v3879_v5 = vpack.c.bf16 %v75_v3, %v74_v2  ;;  %v3882_v7 = vpack.c.bf16 %v77_v6, %v76_v4  ;;  %v91_v8 = vld [vmem:[#allocation2] sm:$0x1]  ;;  %v191_v26 = vld [vmem:[#allocation2 + $0x1] sm:$0x1]  ;;  %v292_v44 = vld [vmem:[#allocation2 + $0x2] sm:$0x1] }
  0x4e   :  { %v393_v62 = vld [vmem:[#allocation2 + $0x3] sm:$0x1]  ;;  %vm1165_vm2 = vcmask 1040384   ;;  %s3794_s8 = smov [#allocation10]  }
  0x4f   :  { %3287 = vmatpush3.bf16.msra.mxu0 %v3879_v5  ;;  %3293 = vmatpush3.bf16.msra.mxu1 %v3879_v5  ;;  %s2971_s9 = sshll.u32 %s3794_s8, 4  ;;  %s2972_s9 = int_to_ptr.vmem [resolvable:$true] %s2971_s9 }
  0x50   :  { %3288 = vmatprep.subr.bf16.mxu0 %v3788_v0  ;;  %3294 = vmatprep.subr.bf16.mxu1 %v3788_v0  ;;  %s3748_s11 = scalar_lea.vmem %s2972_s9, 256  ;;  %p3753_p5 = scmp.lt.s32.totalorder %s2972_s9, %s2972_s9 }
  0x51   :  { %p3749_p4 = scmp.ne.s32.totalorder %s2972_s9, %s3748_s11  ;;  %p3754_p6 = scmp.lt.s32.totalorder %s3748_s11, %s3748_s11 }
  0x53   :  { %3290 = vmatpush3.bf16.msra.mxu0 %v3882_v7  ;;  %3296 = vmatpush3.bf16.msra.mxu1 %v3882_v7  ;;  %p3755_p7 = por %p3754_p6, %p3753_p5 }
  0x54   :  { %3297 = vmatprep.subr.bf16.mxu0 %v3788_v0  ;;  %3303 = vmatprep.subr.bf16.mxu1 %v3788_v0 }
  0x55   :  { %p3756_p8 = pnand %p3755_p7, %p3749_p4 }
  0x56   :  { %3118 = vmatmul.mubr.f32.vlgmr.msra.gmra.mrb[0].mxu0 %v3790_v1 }
  0x57   :  { %3299 = vmatpush3.bf16.msra.mxu0 %v3879_v5  ;;  %3139 = vmatprep.mubr.msk.f32.mxu0 %vm3789_vm0, %v3790_v1 }
  0x58   :  { %3300 = vmatprep.subr.bf16.mxu0 %v3788_v0 }
  0x5b   :  { %3302 = vmatpush3.bf16.msra.mxu0 %v3882_v7 }
  0x5c   :  { %3309 = vmatprep.subr.bf16.mxu0 %v3788_v0 }
 0x129   :  { %v162_v9 = vpop.f32.mrb[0].mxu0 }
 0x12a   :  { %v166_v10 = vadd.f32 %v162_v9, %v91_v8  ;;  %v3119_v11 = vpop.f32.mrb[1].mxu0 }
 0x12c   :  { %3484 = vtanh.f32 %v166_v10  ;;  %v2989_v13 = vmul.f32 -1.442695, %v166_v10 }
 0x12e   :  { %3486 = vpow2.f32 %v2989_v13 }
 0x136   :  { %v3485_v12 = vpop.eup %3484 }
 0x137   :  { %176 = vrot.lane.b32.xlu0 %v3485_v12, %s3791_s3 }
 0x138   :  { %v3487_v14 = vpop.eup %3486 }
 0x139   :  { %v170_v15 = vadd.f32 1.0, %v3487_v14 }
 0x13b   :  { %3488 = vrcp.f32 %v170_v15 }
 0x145   :  { %v3489_v16 = vpop.eup %3488 }
 0x146   :  { %v174_v19 = vmul.f32 0.0, %v3489_v16 }
 0x1a9   :  { %v177_v17 = vpop.permute.xlu0 %176 }
 0x1aa   :  { %v179_v18 = vmul.f32 %v3489_v16, %v177_v17 }
 0x1ac   :  { %181 = vrot.lane.b32.xlu0 %v179_v18, %s3792_s18 }
 0x21e   :  { %v182_v20 = vpop.permute.xlu0 %181 }
 0x21f   :  { %v184_v21 = vadd.f32 %v182_v20, %v174_v19  ;;  %v494_v20 = vld [vmem:[#allocation2 + $0x4] sm:$0x1] }
 0x221   :  { %3490 = vtanh.f32 %v184_v21 }
 0x22b   :  { %v3491_v22 = vpop.eup %3490 }
 0x22c   :  { %187 = vrot.lane.b32.xlu1 %v3491_v22, %s3791_s3 }
 0x29e   :  { %v188_v23 = vpop.permute.xlu1 %187 }
 0x29f   :  { %v190_v24 = vmul.f32 %v3489_v16, %v188_v23 }
 0x2a1   :  { %193 = vrot.lane.b32.xlu1 %v190_v24, %s3792_s18 }
 0x313   :  { %v194_v25 = vpop.permute.xlu1 %193 }
 0x314   :  { %3129 = vmatmul.mubr.msk.f32.vlgmr.msra.gmra.mrb[0].mxu1 %vm92_vm1, %v194_v25 }
 0x315   :  { %3305 = vmatpush3.bf16.msra.mxu1 %v3879_v5  ;;  %3150 = vmatprep.mubr.msk.f32.mxu1 %vm3789_vm0, %v3790_v1 }
 0x316   :  { %3306 = vmatprep.subr.bf16.mxu1 %v3788_v0 }
 0x319   :  { %3308 = vmatpush3.bf16.msra.mxu1 %v3882_v7 }
 0x31a   :  { %3315 = vmatprep.subr.bf16.mxu1 %v3788_v0 }
 0x3e7   :  { %v263_v27 = vpop.f32.mrb[0].mxu1 }
 0x3e8   :  { %v267_v28 = vadd.f32 %v263_v27, %v191_v26  ;;  %v3130_v29 = vpop.f32.mrb[1].mxu1 }
 0x3ea   :  { %3492 = vtanh.f32 %v267_v28  ;;  %v2991_v31 = vmul.f32 -1.442695, %v267_v28 }
 0x3ec   :  { %3494 = vpow2.f32 %v2991_v31 }
 0x3f4   :  { %v3493_v30 = vpop.eup %3492 }
 0x3f5   :  { %277 = vrot.lane.b32.xlu0 %v3493_v30, %s3791_s3 }
 0x3f6   :  { %v3495_v32 = vpop.eup %3494 }
 0x3f7   :  { %v271_v33 = vadd.f32 1.0, %v3495_v32 }
 0x3f9   :  { %3496 = vrcp.f32 %v271_v33 }
 0x403   :  { %v3497_v34 = vpop.eup %3496 }
 0x404   :  { %v275_v37 = vmul.f32 %v3497_v34, %v184_v21 }
 0x467   :  { %v278_v35 = vpop.permute.xlu0 %277 }
 0x468   :  { %v280_v36 = vmul.f32 %v3497_v34, %v278_v35 }
 0x46a   :  { %282 = vrot.lane.b32.xlu1 %v280_v36, %s3792_s18 }
 0x4dc   :  { %v283_v38 = vpop.permute.xlu1 %282 }
 0x4dd   :  { %v285_v39 = vadd.f32 %v283_v38, %v275_v37  ;;  %v595_v38 = vld [vmem:[#allocation2 + $0x5] sm:$0x1] }
 0x4df   :  { %3498 = vtanh.f32 %v285_v39 }
 0x4e9   :  { %v3499_v40 = vpop.eup %3498 }
 0x4ea   :  { %288 = vrot.lane.b32.xlu0 %v3499_v40, %s3791_s3 }
 0x55c   :  { %v289_v41 = vpop.permute.xlu0 %288 }
 0x55d   :  { %v291_v42 = vmul.f32 %v3497_v34, %v289_v41 }
 0x55f   :  { %294 = vrot.lane.b32.xlu1 %v291_v42, %s3792_s18 }
 0x5d1   :  { %v295_v43 = vpop.permute.xlu1 %294 }
 0x5d2   :  { %3140 = vmatmul.mubr.msk.f32.vlgmr.msra.gmra.mrb[2].mxu0 %vm92_vm1, %v295_v43 }
 0x5d3   :  { %3311 = vmatpush3.bf16.msra.mxu0 %v3879_v5  ;;  %3161 = vmatprep.mubr.msk.f32.mxu0 %vm3789_vm0, %v3790_v1 }
 0x5d4   :  { %3312 = vmatprep.subr.bf16.mxu0 %v3788_v0 }
 0x5d7   :  { %3314 = vmatpush3.bf16.msra.mxu0 %v3882_v7 }
 0x5d8   :  { %3321 = vmatprep.subr.bf16.mxu0 %v3788_v0 }
 0x6a5   :  { %v364_v45 = vpop.f32.mrb[2].mxu0 }
 0x6a6   :  { %v368_v46 = vadd.f32 %v364_v45, %v292_v44  ;;  %v3141_v47 = vpop.f32.mrb[3].mxu0 }
 0x6a8   :  { %3500 = vtanh.f32 %v368_v46  ;;  %v2993_v49 = vmul.f32 -1.442695, %v368_v46 }
 0x6aa   :  { %3502 = vpow2.f32 %v2993_v49 }
 0x6b2   :  { %v3501_v48 = vpop.eup %3500 }
 0x6b3   :  { %378 = vrot.lane.b32.xlu0 %v3501_v48, %s3791_s3 }
 0x6b4   :  { %v3503_v50 = vpop.eup %3502 }
 0x6b5   :  { %v372_v51 = vadd.f32 1.0, %v3503_v50 }
 0x6b7   :  { %3504 = vrcp.f32 %v372_v51 }
 0x6c1   :  { %v3505_v52 = vpop.eup %3504 }
 0x6c2   :  { %v376_v55 = vmul.f32 %v3505_v52, %v285_v39 }
 0x725   :  { %v379_v53 = vpop.permute.xlu0 %378 }
 0x726   :  { %v381_v54 = vmul.f32 %v3505_v52, %v379_v53 }
 0x728   :  { %383 = vrot.lane.b32.xlu1 %v381_v54, %s3792_s18  ;;  %v696_v54 = vld [vmem:[#allocation2 + $0x6] sm:$0x1] }
 0x79a   :  { %v384_v56 = vpop.permute.xlu1 %383 }
 0x79b   :  { %v386_v57 = vadd.f32 %v384_v56, %v376_v55 }
 0x79d   :  { %3506 = vtanh.f32 %v386_v57 }
 0x7a7   :  { %v3507_v58 = vpop.eup %3506 }
 0x7a8   :  { %389 = vrot.lane.b32.xlu0 %v3507_v58, %s3791_s3 }
 0x81a   :  { %v390_v59 = vpop.permute.xlu0 %389 }
 0x81b   :  { %v392_v60 = vmul.f32 %v3505_v52, %v390_v59 }
 0x81d   :  { %395 = vrot.lane.b32.xlu1 %v392_v60, %s3792_s18 }
 0x88f   :  { %v396_v61 = vpop.permute.xlu1 %395 }
 0x890   :  { %3151 = vmatmul.mubr.msk.f32.vlgmr.msra.gmra.mrb[2].mxu1 %vm92_vm1, %v396_v61 }
 0x891   :  { %3317 = vmatpush3.bf16.msra.mxu1 %v3879_v5  ;;  %3172 = vmatprep.mubr.msk.f32.mxu1 %vm3789_vm0, %v3790_v1 }
 0x892   :  { %3318 = vmatprep.subr.bf16.mxu1 %v3788_v0 }
 0x895   :  { %3320 = vmatpush3.bf16.msra.mxu1 %v3882_v7 }
 0x896   :  { %3327 = vmatprep.subr.bf16.mxu1 %v3788_v0 }
 0x963   :  { %v465_v63 = vpop.f32.mrb[2].mxu1 }
 0x964   :  { %v469_v2 = vadd.f32 %v465_v63, %v393_v62  ;;  %v3152_v3 = vpop.f32.mrb[3].mxu1 }
 0x966   :  { %3508 = vtanh.f32 %v469_v2  ;;  %v2995_v6 = vmul.f32 -1.442695, %v469_v2 }
 0x968   :  { %3510 = vpow2.f32 %v2995_v6 }
 0x970   :  { %v3509_v4 = vpop.eup %3508 }
 0x971   :  { %479 = vrot.lane.b32.xlu0 %v3509_v4, %s3791_s3 }
 0x972   :  { %v3511_v8 = vpop.eup %3510 }
 0x973   :  { %v473_v9 = vadd.f32 1.0, %v3511_v8 }
 0x975   :  { %3512 = vrcp.f32 %v473_v9 }
 0x97f   :  { %v3513_v10 = vpop.eup %3512 }
 0x980   :  { %v477_v13 = vmul.f32 %v3513_v10, %v386_v57 }
 0x9e3   :  { %v480_v11 = vpop.permute.xlu0 %479 }
 0x9e4   :  { %v482_v12 = vmul.f32 %v3513_v10, %v480_v11 }
 0x9e6   :  { %484 = vrot.lane.b32.xlu1 %v482_v12, %s3792_s18  ;;  %v797_v12 = vld [vmem:[#allocation2 + $0x7] sm:$0x1] }
 0xa58   :  { %v485_v14 = vpop.permute.xlu1 %484 }
 0xa59   :  { %v487_v15 = vadd.f32 %v485_v14, %v477_v13 }
 0xa5b   :  { %3514 = vtanh.f32 %v487_v15 }
 0xa65   :  { %v3515_v16 = vpop.eup %3514 }
 0xa66   :  { %490 = vrot.lane.b32.xlu0 %v3515_v16, %s3791_s3 }
 0xad8   :  { %v491_v17 = vpop.permute.xlu0 %490 }
 0xad9   :  { %v493_v18 = vmul.f32 %v3513_v10, %v491_v17 }
 0xadb   :  { %496 = vrot.lane.b32.xlu1 %v493_v18, %s3792_s18 }
 0xb4d   :  { %v497_v19 = vpop.permute.xlu1 %496 }
 0xb4e   :  { %3162 = vmatmul.mubr.msk.f32.vlgmr.msra.gmra.mrb[4].mxu0 %vm92_vm1, %v497_v19 }
 0xb4f   :  { %3323 = vmatpush3.bf16.msra.mxu0 %v3879_v5  ;;  %3183 = vmatprep.mubr.msk.f32.mxu0 %vm3789_vm0, %v3790_v1 }
 0xb50   :  { %3324 = vmatprep.subr.bf16.mxu0 %v3788_v0 }
 0xb53   :  { %3326 = vmatpush3.bf16.msra.mxu0 %v3882_v7 }
 0xc21   :  { %v566_v21 = vpop.f32.mrb[4].mxu0 }
 0xc22   :  { %v570_v22 = vadd.f32 %v566_v21, %v494_v20  ;;  %v3163_v23 = vpop.f32.mrb[5].mxu0 }
 0xc24   :  { %3516 = vtanh.f32 %v570_v22  ;;  %v2997_v25 = vmul.f32 -1.442695, %v570_v22 }
 0xc26   :  { %3518 = vpow2.f32 %v2997_v25 }
 0xc2e   :  { %v3517_v24 = vpop.eup %3516 }
 0xc2f   :  { %580 = vrot.lane.b32.xlu0 %v3517_v24, %s3791_s3 }
 0xc30   :  { %v3519_v26 = vpop.eup %3518 }
 0xc31   :  { %v574_v27 = vadd.f32 1.0, %v3519_v26  ;;  %v79_v26 = vld [vmem:[#allocation8 + $0x8] sm:$0xff] }
 0xc33   :  { %3520 = vrcp.f32 %v574_v27  ;;  %v82_v27 = vld [vmem:[#allocation8 + $0x20] sm:$0xff] }
 0xc3d   :  { %v3521_v28 = vpop.eup %3520 }
 0xc3e   :  { %v578_v31 = vmul.f32 %v3521_v28, %v487_v15 }
 0xca1   :  { %v581_v29 = vpop.permute.xlu0 %580 }
 0xca2   :  { %v583_v30 = vmul.f32 %v3521_v28, %v581_v29  ;;  %v3965_v29 = vpack.c.bf16 %v82_v27, %v79_v26 }
 0xca4   :  { %585 = vrot.lane.b32.xlu1 %v583_v30, %s3792_s18  ;;  %v81_v30 = vld [vmem:[#allocation8 + $0x18] sm:$0xff]  ;;  %3334 = vmatprep.subr.bf16.mxu0 %v3965_v29 }
 0xd16   :  { %v586_v32 = vpop.permute.xlu1 %585 }
 0xd17   :  { %v588_v33 = vadd.f32 %v586_v32, %v578_v31  ;;  %v85_v31 = vld [vmem:[#allocation8 + $0x38] sm:$0xff]  ;;  %v88_v32 = vld [vmem:[#allocation8 + $0x50] sm:$0xff] }
 0xd19   :  { %3522 = vtanh.f32 %v588_v33 }
 0xd23   :  { %v3523_v34 = vpop.eup %3522 }
 0xd24   :  { %591 = vrot.lane.b32.xlu0 %v3523_v34, %s3791_s3  ;;  %v3969_v34 = vpack.c.bf16 %v88_v32, %v85_v31 }
 0xd96   :  { %v592_v35 = vpop.permute.xlu0 %591 }
 0xd97   :  { %v594_v36 = vmul.f32 %v3521_v28, %v592_v35  ;;  %v78_v28 = vld [vmem:[#allocation8] sm:$0xff]  ;;  %v84_v35 = vld [vmem:[#allocation8 + $0x30] sm:$0xff] }
 0xd99   :  { %597 = vrot.lane.b32.xlu1 %v594_v36, %s3792_s18  ;;  %v87_v36 = vld [vmem:[#allocation8 + $0x48] sm:$0xff] }
 0xe0b   :  { %v598_v37 = vpop.permute.xlu1 %597 }
 0xe0c   :  { %3173 = vmatmul.mubr.msk.f32.vlgmr.msra.gmra.mrb[4].mxu1 %vm92_vm1, %v598_v37  ;;  %v3974_v37 = vpack.c.bf16 %v87_v36, %v84_v35 }
 0xe0d   :  { %3329 = vmatpush3.bf16.msra.mxu1 %v3879_v5  ;;  %3194 = vmatprep.mubr.msk.f32.mxu1 %vm3789_vm0, %v3790_v1 }
 0xe0e   :  { %3330 = vmatprep.subr.bf16.mxu1 %v3788_v0 }
 0xe11   :  { %3332 = vmatpush3.bf16.msra.mxu1 %v3882_v7 }
 0xe12   :  { %3342 = vmatprep.subr.bf16.mxu1 %v3965_v29 }
 0xedf   :  { %v667_v39 = vpop.f32.mrb[4].mxu1 }
 0xee0   :  { %v671_v40 = vadd.f32 %v667_v39, %v595_v38  ;;  %v3174_v41 = vpop.f32.mrb[5].mxu1 }
 0xee2   :  { %3524 = vtanh.f32 %v671_v40  ;;  %v2999_v43 = vmul.f32 -1.442695, %v671_v40 }
 0xee4   :  { %3526 = vpow2.f32 %v2999_v43 }
 0xeec   :  { %v3525_v42 = vpop.eup %3524 }
 0xeed   :  { %681 = vrot.lane.b32.xlu0 %v3525_v42, %s3791_s3  ;;  %v973_v42 = vld [vmem:[#allocation5] sm:$0x1] }
 0xeee   :  { %v3527_v44 = vpop.eup %3526 }
 0xeef   :  { %v675_v45 = vadd.f32 1.0, %v3527_v44 }
 0xef1   :  { %3528 = vrcp.f32 %v675_v45 }
 0xefb   :  { %v3529_v5 = vpop.eup %3528 }
 0xefc   :  { %v679_v48 = vmul.f32 %v3529_v5, %v588_v33  ;;  %v3967_v33 = vpack.c.bf16 %v81_v30, %v78_v28 }
 0xf5f   :  { %v682_v46 = vpop.permute.xlu0 %681 }
 0xf60   :  { %v684_v47 = vmul.f32 %v3529_v5, %v682_v46 }
 0xf62   :  { %686 = vrot.lane.b32.xlu1 %v684_v47, %s3792_s18 }
 0xfd4   :  { %v687_v7 = vpop.permute.xlu1 %686 }
 0xfd5   :  { %v689_v49 = vadd.f32 %v687_v7, %v679_v48 }
 0xfd7   :  { %3530 = vtanh.f32 %v689_v49 }
 0xfe1   :  { %v3531_v50 = vpop.eup %3530 }
 0xfe2   :  { %692 = vrot.lane.b32.xlu0 %v3531_v50, %s3791_s3 }
0x1054   :  { %v693_v51 = vpop.permute.xlu0 %692 }
0x1055   :  { %v695_v52 = vmul.f32 %v3529_v5, %v693_v51 }
0x1057   :  { %698 = vrot.lane.b32.xlu1 %v695_v52, %s3792_s18 }
0x10c9   :  { %v699_v53 = vpop.permute.xlu1 %698 }
0x10ca   :  { %3184 = vmatmul.mubr.msk.f32.vlgmr.msra.gmra.mrb[6].mxu0 %vm92_vm1, %v699_v53 }
0x10cb   :  { %967 = vmatprep.mubr.f32.mxu0 %v3790_v1  ;;  %3336 = vmatpush1.bf16.msra.mxu0 %v3967_v33 }
0x10cc   :  { %3338 = vmatprep.subr.bf16.mxu0 %v3969_v34 }
0x10cf   :  { %3340 = vmatpush1.bf16.msra.mxu0 %v3974_v37 }
0x10d0   :  { %3349 = vmatprep.subr.bf16.mxu0 %v3788_v0 }
0x119d   :  { %v768_v55 = vpop.f32.mrb[6].mxu0 }
0x119e   :  { %v772_v56 = vadd.f32 %v768_v55, %v696_v54  ;;  %v3185_v57 = vpop.f32.mrb[7].mxu0  ;;  %v80_v54 = vld [vmem:[#allocation8 + $0x10] sm:$0xff]  ;;  %v83_v55 = vld [vmem:[#allocation8 + $0x28] sm:$0xff] }
0x119f   :  { %v3993_v57 = vpack.c.bf16 %v83_v55, %v80_v54 }
0x11a0   :  { %3532 = vtanh.f32 %v772_v56  ;;  %v3001_v59 = vmul.f32 -1.442695, %v772_v56  ;;  %v86_v56 = vld [vmem:[#allocation8 + $0x40] sm:$0xff] }
0x11a2   :  { %3534 = vpow2.f32 %v3001_v59 }
0x11aa   :  { %v3533_v58 = vpop.eup %3532 }
0x11ab   :  { %782 = vrot.lane.b32.xlu0 %v3533_v58, %s3791_s3  ;;  %v89_v58 = vld [vmem:[#allocation8 + $0x58] sm:$0xff] }
0x11ac   :  { %v3535_v60 = vpop.eup %3534  ;;  %v3996_v59 = vpack.c.bf16 %v89_v58, %v86_v56 }
0x11ad   :  { %v776_v61 = vadd.f32 1.0, %v3535_v60 }
0x11af   :  { %3536 = vrcp.f32 %v776_v61  ;;  %v974_v61 = vlaneseq }
0x11b9   :  { %v3537_v62 = vpop.eup %3536 }
0x11ba   :  { %v780_v3 = vmul.f32 %v3537_v62, %v689_v49 }
0x121d   :  { %v783_v63 = vpop.permute.xlu0 %782 }
0x121e   :  { %v785_v2 = vmul.f32 %v3537_v62, %v783_v63 }
0x1220   :  { %787 = vrot.lane.b32.xlu1 %v785_v2, %s3792_s18 }
0x1292   :  { %v788_v4 = vpop.permute.xlu1 %787 }
0x1293   :  { %v790_v6 = vadd.f32 %v788_v4, %v780_v3 }
0x1295   :  { %3538 = vtanh.f32 %v790_v6 }
0x129f   :  { %v3539_v8 = vpop.eup %3538 }
0x12a0   :  { %793 = vrot.lane.b32.xlu0 %v3539_v8, %s3791_s3 }
0x1312   :  { %v794_v9 = vpop.permute.xlu0 %793 }
0x1313   :  { %v796_v10 = vmul.f32 %v3537_v62, %v794_v9  ;;  %v4003_v62 = vshrl.u32 %v974_v61, 7  ;;  %v90_v9 = vld [vmem:[%s4420_s4] sm:$0x3] }
0x1315   :  { %799 = vrot.lane.b32.xlu1 %v796_v10, %s3792_s18  ;;  %v4006_v63 = vsub.s32 0, %v4003_v62  ;;  %v1159_v8 = vsub.s32 1, %v4003_v62 }
0x1317   :  { %v4027_v10 = vrot.slane %v90_v9, %v1159_v8 }
0x1387   :  { %v800_v11 = vpop.permute.xlu1 %799 }
0x1388   :  { %3195 = vmatmul.mubr.msk.f32.vlgmr.msra.gmra.mrb[6].mxu1 %vm92_vm1, %v800_v11  ;;  %v4030_v11 = vrot.slane %v90_v9, %v4006_v63 }
0x1389   :  { %1075 = vmatprep.mubr.f32.mxu1 %v3790_v1  ;;  %3344 = vmatpush1.bf16.msra.mxu1 %v3967_v33 }
0x138a   :  { %3346 = vmatprep.subr.bf16.mxu1 %v3969_v34 }
0x138d   :  { %3348 = vmatpush1.bf16.msra.mxu1 %v3974_v37 }
0x138e   :  { %3356 = vmatprep.subr.bf16.mxu1 %v3965_v29 }
0x145b   :  { %v869_v13 = vpop.f32.mrb[6].mxu1 }
0x145c   :  { %v873_v14 = vadd.f32 %v869_v13, %v797_v12  ;;  %v3196_v15 = vpop.f32.mrb[7].mxu1 }
0x145e   :  { %3540 = vtanh.f32 %v873_v14  ;;  %v3003_v17 = vmul.f32 -1.442695, %v873_v14 }
0x1460   :  { %3542 = vpow2.f32 %v3003_v17 }
0x1468   :  { %v3541_v16 = vpop.eup %3540 }
0x1469   :  { %883 = vrot.lane.b32.xlu0 %v3541_v16, %s3791_s3 }
0x146a   :  { %v3543_v18 = vpop.eup %3542 }
0x146b   :  { %v877_v19 = vadd.f32 1.0, %v3543_v18 }
0x146d   :  { %3544 = vrcp.f32 %v877_v19 }
0x1477   :  { %v3545_v20 = vpop.eup %3544 }
0x1478   :  { %v881_v23 = vmul.f32 %v3545_v20, %v790_v6 }
0x14db   :  { %v884_v21 = vpop.permute.xlu0 %883 }
0x14dc   :  { %v886_v22 = vmul.f32 %v3545_v20, %v884_v21  ;;  %v4043_v21 = vand.u32 127, %v974_v61 }
0x14de   :  { %888 = vrot.lane.b32.xlu1 %v886_v22, %s3792_s18  ;;  %v4046_v22 = vadd.s32 128, %v4043_v21 }
0x1550   :  { %v889_v24 = vpop.permute.xlu1 %888 }
0x1551   :  { %v891_v25 = vadd.f32 %v889_v24, %v881_v23 }
0x1553   :  { %3546 = vtanh.f32 %v891_v25 }
0x155d   :  { %v3547_v38 = vpop.eup %3546 }
0x155e   :  { %894 = vrot.lane.b32.xlu0 %v3547_v38, %s3791_s3 }
0x15d0   :  { %v895_v39 = vpop.permute.xlu0 %894 }
0x15d1   :  { %v897_v40 = vmul.f32 %v3545_v20, %v895_v39 }
0x15d3   :  { %899 = vrot.lane.b32.xlu1 %v897_v40, %s3792_s18 }
0x1645   :  { %v900_v41 = vpop.permute.xlu1 %899 }
0x1646   :  { %3004 = vmatmul.mubr.msk.f32.vlgmr.msra.gmra.mrb[8].mxu0 %vm92_vm1, %v900_v41 }
0x1647   :  { %3205 = vmatprep.mubr.msk.f32.mxu0 %vm3789_vm0, %v3790_v1  ;;  %3351 = vmatpush3.bf16.msra.mxu0 %v3993_v57 }
0x1648   :  { %3352 = vmatprep.subr.bf16.mxu0 %v3788_v0 }
0x164b   :  { %3354 = vmatpush3.bf16.msra.mxu0 %v3996_v59 }
0x164c   :  { %3363 = vmatprep.subr.bf16.mxu0 %v3788_v0 }
0x1719   :  { %v969_v43 = vpop.f32.mrb[8].mxu0 }
0x171a   :  { %v977_v44 = vadd.f32 %v973_v42, %v969_v43  ;;  %v971_v45 = vpop.f32.mrb[9].mxu0 }
0x171c   :  { %3548 = vtanh.f32 %v977_v44  ;;  %v3005_v46 = vmul.f32 -1.442695, %v977_v44 }
0x171e   :  { %3550 = vpow2.f32 %v3005_v46 }
0x1726   :  { %v3549_v5 = vpop.eup %3548 }
0x1727   :  { %987 = vrot.lane.b32.xlu0 %v3549_v5, %s3791_s3 }
0x1728   :  { %v3551_v47 = vpop.eup %3550 }
0x1729   :  { %v981_v48 = vadd.f32 1.0, %v3551_v47 }
0x172b   :  { %3552 = vrcp.f32 %v981_v48 }
0x1735   :  { %v3553_v7 = vpop.eup %3552 }
0x1736   :  { %v985_v51 = vmul.f32 %v3553_v7, %v891_v25 }
0x1799   :  { %v988_v49 = vpop.permute.xlu0 %987 }
0x179a   :  { %v990_v50 = vmul.f32 %v3553_v7, %v988_v49 }
0x179c   :  { %992 = vrot.lane.b32.xlu1 %v990_v50, %s3792_s18 }
0x180e   :  { %v993_v52 = vpop.permute.xlu1 %992 }
0x180f   :  { %v3990_v53 = vadd.f32 %v993_v52, %v985_v51 }
0x1811   :  { %3554 = vtanh.f32 %v3990_v53 }
0x181b   :  { %v3555_v60 = vpop.eup %3554 }
0x181c   :  { %998 = vrot.lane.b32.xlu0 %v3555_v60, %s3791_s3 }
0x188e   :  { %v999_v2 = vpop.permute.xlu0 %998 }
0x188f   :  { %v1001_v3 = vmul.f32 %v3553_v7, %v999_v2 }
0x1891   :  { %v1006_v4 = vrot.slane %v1001_v3, %v4006_v63 }
0x1893   :  { %1007 = vrot.lane.b32.xlu1 %v1006_v4, %s3792_s18 }
0x1905   :  { %v1008_v6 = vpop.permute.xlu1 %1007 }
0x1906   :  { %3006 = vmatmul.mubr.msk.f32.vlgmr.msra.gmra.mrb[8].mxu1 %vm92_vm1, %v1008_v6  ;;  %3206 = vmatmul.mubr.msk.f32.vlgmr.msra.gmra.mrb[10].mxu0 %vm92_vm1, %v1008_v6 }
0x1907   :  { %3358 = vmatpush1.bf16.msra.mxu1 %v3967_v33  ;;  %3365 = vmatpush3.bf16.msra.mxu0 %v3993_v57 }
0x1908   :  { %3360 = vmatprep.subr.bf16.mxu1 %v3969_v34  ;;  %3366 = vmatprep.subr.bf16.mxu0 %v3788_v0 }
0x1909   :  { %1341 = vmatprep.mubr.f32.mxu1 %v3790_v1  ;;  %3216 = vmatprep.mubr.msk.f32.mxu0 %vm3789_vm0, %v3790_v1 }
0x190b   :  { %3362 = vmatpush1.bf16.msra.mxu1 %v3974_v37  ;;  %3368 = vmatpush3.bf16.msra.mxu0 %v3996_v59 }
0x190c   :  { %3370 = vmatprep.subr.bf16.mxu1 %v3965_v29  ;;  %3377 = vmatprep.subr.bf16.mxu0 %v3788_v0 }
0x19d9   :  { %v1077_v12 = vpop.f32.mrb[8].mxu1  ;;  %v1148_v13 = vpop.f32.mrb[10].mxu0 }
0x19da   :  { %v4033_v14 = vadd.f32 %v4027_v10, %v1148_v13  ;;  %v1079_v15 = vpop.f32.mrb[9].mxu1  ;;  %v3207_v16 = vpop.f32.mrb[11].mxu0 }
0x19db   :  { %v4036_v17 = vadd.f32 %v4030_v11, %v1079_v15 }
0x19dc   :  { %v1167_v18 = vsel %vm1165_vm2, %v4033_v14, -inf }
0x19dd   :  { %v1166_v19 = vsel %vm1165_vm2, %v4036_v17, -inf }
0x19de   :  { %v1168_v20 = vmax.f32 %v1166_v19, %v1167_v18 }
0x19e0   :  { %1169 = vmax.xlane.f32.xlu0 %v1168_v20 }
0x1a6d   :  { %v4048_v23 = vpop.xlane.xlu0 %1169 }
0x1a6e   :  { %vm1171_vm3 = vcmp.ge.f32.partialorder %v4036_v17, %v4048_v23  ;;  %vm1172_vm4 = vcmp.ge.f32.partialorder %v4033_v14, %v4048_v23 }
0x1a6f   :  { %v1173_v24 = vsel %vm1171_vm3, %v4043_v21, 255  ;;  %v1174_v25 = vsel %vm1172_vm4, %v4046_v22, 255 }
0x1a70   :  { %v1175_v26 = vsel %vm1165_vm2, %v1173_v24, 2147483647  ;;  %v1176_v27 = vsel %vm1165_vm2, %v1174_v25, 2147483647 }
0x1a71   :  { %vm1177_vm5 = vcmp.lt.s32.totalorder %v1175_v26, %v1176_v27 }
0x1a72   :  { %v1178_v28 = vsel %vm1177_vm5, %v1175_v26, %v1176_v27 }
0x1a73   :  { %v1180_v30 = vshra.s32 %v1178_v28, 16  ;;  %v1179_v32 = vand.u32 65535, %v1178_v28 }
0x1a75   :  { %v1182_v31 = vcvt.s32.f32 %v1180_v30  ;;  %v1181_v36 = vcvt.s32.f32 %v1179_v32 }
0x1a77   :  { %1183 = vmin.xlane.f32.xlu1 %v1182_v31 }
0x1b04   :  { %v1184_v35 = vpop.xlane.xlu1 %1183 }
0x1b05   :  { %vm1185_vm6 = vcmp.eq.f32.partialorder %v1182_v31, %v1184_v35  ;;  %v1190_v39 = vcvt.f32.s32 %v1184_v35 }
0x1b06   :  { %v1186_v38 = vsel %vm1185_vm6, %v1181_v36, inf }
0x1b07   :  { %1187 = vmin.xlane.f32.xlu0 %v1186_v38  ;;  %v1191_v41 = vshll.u32 %v1190_v39, 16 }
0x1b94   :  { %v1188_v40 = vpop.xlane.xlu0 %1187 }
0x1b95   :  { %v1189_v42 = vcvt.f32.s32 %v1188_v40 }
0x1b97   :  { %v1192_v43 = vadd.s32 %v1191_v41, %v1189_v42 }
0x1b99   :  { %v1193_v44 = vrot.slane %v1192_v43, 4 }
0x1b9b   :  { %vm1194_vm7 = vcmp.lt.s32.totalorder %v1192_v43, %v1193_v44 }
0x1b9c   :  { %v1195_v45 = vsel %vm1194_vm7, %v1192_v43, %v1193_v44 }
0x1b9d   :  { %v1196_v5 = vrot.slane %v1195_v45, 2 }
0x1b9f   :  { %vm1197_vm8 = vcmp.lt.s32.totalorder %v1195_v45, %v1196_v5 }
0x1ba0   :  { %v1198_v46 = vsel %vm1197_vm8, %v1195_v45, %v1196_v5 }
0x1ba1   :  { %v1199_v47 = vrot.slane %v1198_v46, 1 }
0x1ba3   :  { %vm1200_vm9 = vcmp.lt.s32.totalorder %v1198_v46, %v1199_v47 }
0x1ba4   :  { %v1201_v48 = vsel %vm1200_vm9, %v1198_v46, %v1199_v47 }
0x1ba5   :  { %3453 = vpush %v1201_v48 }
0x1bd6   :  { %s3454_s4 = spop %3453 }
0x1bd7   :  { %s1203_s21 = scalar_lea.vmem [#allocation5], %s3454_s4 }
0x1bd8   :  { %v1204_v7 = vld [vmem:[%s1203_s21] sm:$0x1] }
0x1bd9   :  { %v1243_v49 = vadd.f32 %v1204_v7, %v1077_v12 }
0x1bdb   :  { %3556 = vtanh.f32 %v1243_v49  ;;  %v3008_v51 = vmul.f32 -1.442695, %v1243_v49 }
0x1bdd   :  { %3558 = vpow2.f32 %v3008_v51 }
0x1be5   :  { %v3557_v50 = vpop.eup %3556 }
0x1be6   :  { %1253 = vrot.lane.b32.xlu0 %v3557_v50, %s3791_s3 }
0x1be7   :  { %v3559_v52 = vpop.eup %3558 }
0x1be8   :  { %v1247_v54 = vadd.f32 1.0, %v3559_v52 }
0x1bea   :  { %3560 = vrcp.f32 %v1247_v54 }
0x1bf4   :  { %v3561_v55 = vpop.eup %3560 }
0x1bf5   :  { %v1251_v60 = vmul.f32 %v3561_v55, %v3990_v53 }
0x1c58   :  { %v1254_v56 = vpop.permute.xlu0 %1253 }
0x1c59   :  { %v1256_v58 = vmul.f32 %v3561_v55, %v1254_v56 }
0x1c5b   :  { %1258 = vrot.lane.b32.xlu1 %v1256_v58, %s3792_s18 }
0x1ccd   :  { %v1259_v2 = vpop.permute.xlu1 %1258 }
0x1cce   :  { %v4061_v3 = vadd.f32 %v1259_v2, %v1251_v60 }
0x1cd0   :  { %3562 = vtanh.f32 %v4061_v3 }
0x1cda   :  { %v3563_v4 = vpop.eup %3562 }
0x1cdb   :  { %1264 = vrot.lane.b32.xlu1 %v3563_v4, %s3791_s3 }
0x1d4d   :  { %v1265_v6 = vpop.permute.xlu1 %1264 }
0x1d4e   :  { %v1267_v8 = vmul.f32 %v3561_v55, %v1265_v6 }
0x1d50   :  { %v1272_v9 = vrot.slane %v1267_v8, %v4006_v63 }
0x1d52   :  { %1273 = vrot.lane.b32.xlu0 %v1272_v9, %s3792_s18 }
0x1dc4   :  { %v1274_v12 = vpop.permute.xlu0 %1273 }
0x1dc5   :  { %3009 = vmatmul.mubr.msk.f32.vlgmr.msra.gmra.mrb[10].mxu1 %vm92_vm1, %v1274_v12  ;;  %3217 = vmatmul.mubr.msk.f32.vlgmr.msra.gmra.mrb[12].mxu0 %vm92_vm1, %v1274_v12 }
0x1dc6   :  { %3372 = vmatpush1.bf16.msra.mxu1 %v3967_v33  ;;  %3379 = vmatpush3.bf16.msra.mxu0 %v3993_v57 }
0x1dc7   :  { %3374 = vmatprep.subr.bf16.mxu1 %v3969_v34  ;;  %3380 = vmatprep.subr.bf16.mxu0 %v3788_v0 }
0x1dc8   :  { %1592 = vmatprep.mubr.f32.mxu1 %v3790_v1  ;;  %3227 = vmatprep.mubr.msk.f32.mxu0 %vm3789_vm0, %v3790_v1 }
0x1dca   :  { %3376 = vmatpush1.bf16.msra.mxu1 %v3974_v37  ;;  %3382 = vmatpush3.bf16.msra.mxu0 %v3996_v59 }
0x1dcb   :  { %3384 = vmatprep.subr.bf16.mxu1 %v3965_v29  ;;  %3391 = vmatprep.subr.bf16.mxu0 %v3788_v0 }
0x1e98   :  { %v1343_v53 = vpop.f32.mrb[10].mxu1  ;;  %v1414_v13 = vpop.f32.mrb[12].mxu0 }
0x1e99   :  { %v4081_v15 = vadd.f32 %v1414_v13, %v4027_v10  ;;  %v1345_v16 = vpop.f32.mrb[11].mxu1  ;;  %v3218_v18 = vpop.f32.mrb[13].mxu0 }
0x1e9a   :  { %v4084_v19 = vadd.f32 %v1345_v16, %v4030_v11 }
0x1e9b   :  { %v1421_v20 = vsel %vm1165_vm2, %v4081_v15, -inf }
0x1e9c   :  { %v1420_v24 = vsel %vm1165_vm2, %v4084_v19, -inf }
0x1e9d   :  { %v1422_v25 = vmax.f32 %v1420_v24, %v1421_v20 }
0x1e9f   :  { %1423 = vmax.xlane.f32.xlu1 %v1422_v25 }
0x1f2c   :  { %v4090_v26 = vpop.xlane.xlu1 %1423 }
0x1f2d   :  { %vm1425_vm10 = vcmp.ge.f32.partialorder %v4084_v19, %v4090_v26  ;;  %vm1426_vm11 = vcmp.ge.f32.partialorder %v4081_v15, %v4090_v26 }
0x1f2e   :  { %v1427_v27 = vsel %vm1425_vm10, %v4043_v21, 255  ;;  %v1428_v28 = vsel %vm1426_vm11, %v4046_v22, 255 }
0x1f2f   :  { %v1429_v30 = vsel %vm1165_vm2, %v1427_v27, 2147483647  ;;  %v1430_v31 = vsel %vm1165_vm2, %v1428_v28, 2147483647 }
0x1f30   :  { %vm1431_vm12 = vcmp.lt.s32.totalorder %v1429_v30, %v1430_v31 }
0x1f31   :  { %v1432_v32 = vsel %vm1431_vm12, %v1429_v30, %v1430_v31 }
0x1f32   :  { %v1434_v35 = vshra.s32 %v1432_v32, 16  ;;  %v1433_v38 = vand.u32 65535, %v1432_v32 }
0x1f34   :  { %v1436_v36 = vcvt.s32.f32 %v1434_v35  ;;  %v1435_v40 = vcvt.s32.f32 %v1433_v38 }
0x1f36   :  { %1437 = vmin.xlane.f32.xlu0 %v1436_v36 }
0x1fc3   :  { %v1438_v39 = vpop.xlane.xlu0 %1437 }
0x1fc4   :  { %vm1439_vm13 = vcmp.eq.f32.partialorder %v1436_v36, %v1438_v39  ;;  %v1444_v42 = vcvt.f32.s32 %v1438_v39 }
0x1fc5   :  { %v1440_v41 = vsel %vm1439_vm13, %v1435_v40, inf }
0x1fc6   :  { %1441 = vmin.xlane.f32.xlu0 %v1440_v41  ;;  %v1445_v44 = vshll.u32 %v1444_v42, 16 }
0x2053   :  { %v1442_v43 = vpop.xlane.xlu0 %1441 }
0x2054   :  { %v1443_v45 = vcvt.f32.s32 %v1442_v43 }
0x2056   :  { %v1446_v5 = vadd.s32 %v1445_v44, %v1443_v45 }
0x2058   :  { %v1447_v46 = vrot.slane %v1446_v5, 4 }
0x205a   :  { %vm1448_vm14 = vcmp.lt.s32.totalorder %v1446_v5, %v1447_v46 }
0x205b   :  { %v1449_v47 = vsel %vm1448_vm14, %v1446_v5, %v1447_v46 }
0x205c   :  { %v1450_v48 = vrot.slane %v1449_v47, 2 }
0x205e   :  { %vm1451_vm15 = vcmp.lt.s32.totalorder %v1449_v47, %v1450_v48 }
0x205f   :  { %v1452_v7 = vsel %vm1451_vm15, %v1449_v47, %v1450_v48 }
0x2060   :  { %v1453_v49 = vrot.slane %v1452_v7, 1 }
0x2062   :  { %vm1454_vm3 = vcmp.lt.s32.totalorder %v1452_v7, %v1453_v49 }
0x2063   :  { %v1455_v50 = vsel %vm1454_vm3, %v1452_v7, %v1453_v49 }
0x2064   :  { %3455 = vpush %v1455_v50 }
0x2095   :  { %s3456_s22 = spop %3455 }
0x2096   :  { %s1457_s23 = scalar_lea.vmem [#allocation5], %s3456_s22 }
0x2097   :  { %v1458_v51 = vld [vmem:[%s1457_s23] sm:$0x1] }
0x2098   :  { %v1494_v52 = vadd.f32 %v1458_v51, %v1343_v53 }
0x209a   :  { %3564 = vtanh.f32 %v1494_v52  ;;  %v3011_v55 = vmul.f32 -1.442695, %v1494_v52 }
0x209c   :  { %3566 = vpow2.f32 %v3011_v55 }
0x20a4   :  { %v3565_v54 = vpop.eup %3564 }
0x20a5   :  { %1504 = vrot.lane.b32.xlu1 %v3565_v54, %s3791_s3 }
0x20a6   :  { %v3567_v56 = vpop.eup %3566 }
0x20a7   :  { %v1498_v58 = vadd.f32 1.0, %v3567_v56 }
0x20a9   :  { %3568 = vrcp.f32 %v1498_v58 }
0x20b3   :  { %v3569_v60 = vpop.eup %3568 }
0x20b4   :  { %v1502_v6 = vmul.f32 %v3569_v60, %v4061_v3 }
0x2117   :  { %v1505_v2 = vpop.permute.xlu1 %1504 }
0x2118   :  { %v1507_v4 = vmul.f32 %v3569_v60, %v1505_v2 }
0x211a   :  { %1509 = vrot.lane.b32.xlu0 %v1507_v4, %s3792_s18 }
0x218c   :  { %v1510_v8 = vpop.permute.xlu0 %1509 }
0x218d   :  { %v4103_v9 = vadd.f32 %v1510_v8, %v1502_v6 }
0x218f   :  { %3570 = vtanh.f32 %v4103_v9 }
0x2199   :  { %v3571_v12 = vpop.eup %3570 }
0x219a   :  { %1515 = vrot.lane.b32.xlu1 %v3571_v12, %s3791_s3 }
0x220c   :  { %v1516_v53 = vpop.permute.xlu1 %1515 }
0x220d   :  { %v1518_v13 = vmul.f32 %v3569_v60, %v1516_v53 }
0x220f   :  { %v1523_v16 = vrot.slane %v1518_v13, %v4006_v63 }
0x2211   :  { %1524 = vrot.lane.b32.xlu1 %v1523_v16, %s3792_s18 }
0x2283   :  { %v1525_v18 = vpop.permute.xlu1 %1524 }
0x2284   :  { %3012 = vmatmul.mubr.msk.f32.vlgmr.msra.gmra.mrb[12].mxu1 %vm92_vm1, %v1525_v18  ;;  %3228 = vmatmul.mubr.msk.f32.vlgmr.msra.gmra.mrb[14].mxu0 %vm92_vm1, %v1525_v18 }
0x2285   :  { %3386 = vmatpush1.bf16.msra.mxu1 %v3967_v33  ;;  %3393 = vmatpush3.bf16.msra.mxu0 %v3993_v57 }
0x2286   :  { %3388 = vmatprep.subr.bf16.mxu1 %v3969_v34  ;;  %3394 = vmatprep.subr.bf16.mxu0 %v3788_v0 }
0x2287   :  { %1843 = vmatprep.mubr.f32.mxu1 %v3790_v1  ;;  %3238 = vmatprep.mubr.msk.f32.mxu0 %vm3789_vm0, %v3790_v1 }
0x2289   :  { %3390 = vmatpush1.bf16.msra.mxu1 %v3974_v37  ;;  %3396 = vmatpush3.bf16.msra.mxu0 %v3996_v59 }
0x228a   :  { %3398 = vmatprep.subr.bf16.mxu1 %v3965_v29  ;;  %3405 = vmatprep.subr.bf16.mxu0 %v3788_v0 }
0x2357   :  { %v1594_v3 = vpop.f32.mrb[12].mxu1  ;;  %v1665_v20 = vpop.f32.mrb[14].mxu0 }
0x2358   :  { %v4123_v24 = vadd.f32 %v1665_v20, %v4027_v10  ;;  %v1596_v25 = vpop.f32.mrb[13].mxu1  ;;  %v3229_v27 = vpop.f32.mrb[15].mxu0 }
0x2359   :  { %v4126_v28 = vadd.f32 %v1596_v25, %v4030_v11 }
0x235a   :  { %v1672_v30 = vsel %vm1165_vm2, %v4123_v24, -inf }
0x235b   :  { %v1671_v31 = vsel %vm1165_vm2, %v4126_v28, -inf }
0x235c   :  { %v1673_v32 = vmax.f32 %v1671_v31, %v1672_v30 }
0x235e   :  { %1674 = vmax.xlane.f32.xlu0 %v1673_v32 }
0x23eb   :  { %v4132_v35 = vpop.xlane.xlu0 %1674 }
0x23ec   :  { %vm1676_vm4 = vcmp.ge.f32.partialorder %v4126_v28, %v4132_v35  ;;  %vm1677_vm5 = vcmp.ge.f32.partialorder %v4123_v24, %v4132_v35 }
0x23ed   :  { %v1678_v36 = vsel %vm1676_vm4, %v4043_v21, 255  ;;  %v1679_v38 = vsel %vm1677_vm5, %v4046_v22, 255 }
0x23ee   :  { %v1680_v39 = vsel %vm1165_vm2, %v1678_v36, 2147483647  ;;  %v1681_v40 = vsel %vm1165_vm2, %v1679_v38, 2147483647 }
0x23ef   :  { %vm1682_vm6 = vcmp.lt.s32.totalorder %v1680_v39, %v1681_v40 }
0x23f0   :  { %v1683_v41 = vsel %vm1682_vm6, %v1680_v39, %v1681_v40 }
0x23f1   :  { %v1685_v42 = vshra.s32 %v1683_v41, 16  ;;  %v1684_v44 = vand.u32 65535, %v1683_v41 }
0x23f3   :  { %v1687_v43 = vcvt.s32.f32 %v1685_v42  ;;  %v1686_v5 = vcvt.s32.f32 %v1684_v44 }
0x23f5   :  { %1688 = vmin.xlane.f32.xlu1 %v1687_v43 }
0x2482   :  { %v1689_v45 = vpop.xlane.xlu1 %1688 }
0x2483   :  { %vm1690_vm7 = vcmp.eq.f32.partialorder %v1687_v43, %v1689_v45  ;;  %v1695_v47 = vcvt.f32.s32 %v1689_v45 }
0x2484   :  { %v1691_v46 = vsel %vm1690_vm7, %v1686_v5, inf }
0x2485   :  { %1692 = vmin.xlane.f32.xlu0 %v1691_v46  ;;  %v1696_v7 = vshll.u32 %v1695_v47, 16 }
0x2512   :  { %v1693_v48 = vpop.xlane.xlu0 %1692 }
0x2513   :  { %v1694_v49 = vcvt.f32.s32 %v1693_v48 }
0x2515   :  { %v1697_v50 = vadd.s32 %v1696_v7, %v1694_v49 }
0x2517   :  { %v1698_v51 = vrot.slane %v1697_v50, 4 }
0x2519   :  { %vm1699_vm8 = vcmp.lt.s32.totalorder %v1697_v50, %v1698_v51 }
0x251a   :  { %v1700_v52 = vsel %vm1699_vm8, %v1697_v50, %v1698_v51 }
0x251b   :  { %v1701_v54 = vrot.slane %v1700_v52, 2 }
0x251d   :  { %vm1702_vm9 = vcmp.lt.s32.totalorder %v1700_v52, %v1701_v54 }
0x251e   :  { %v1703_v55 = vsel %vm1702_vm9, %v1700_v52, %v1701_v54 }
0x251f   :  { %v1704_v56 = vrot.slane %v1703_v55, 1 }
0x2521   :  { %vm1705_vm10 = vcmp.lt.s32.totalorder %v1703_v55, %v1704_v56 }
0x2522   :  { %v1706_v58 = vsel %vm1705_vm10, %v1703_v55, %v1704_v56 }
0x2523   :  { %3457 = vpush %v1706_v58 }
0x2554   :  { %s3458_s24 = spop %3457 }
0x2555   :  { %s1708_s25 = scalar_lea.vmem [#allocation5], %s3458_s24 }
0x2556   :  { %v1709_v60 = vld [vmem:[%s1708_s25] sm:$0x1] }
0x2557   :  { %v1745_v2 = vadd.f32 %v1709_v60, %v1594_v3 }
0x2559   :  { %3572 = vtanh.f32 %v1745_v2  ;;  %v3014_v6 = vmul.f32 -1.442695, %v1745_v2 }
0x255b   :  { %3574 = vpow2.f32 %v3014_v6 }
0x2563   :  { %v3573_v4 = vpop.eup %3572 }
0x2564   :  { %1755 = vrot.lane.b32.xlu0 %v3573_v4, %s3791_s3 }
0x2565   :  { %v3575_v8 = vpop.eup %3574 }
0x2566   :  { %v1749_v12 = vadd.f32 1.0, %v3575_v8 }
0x2568   :  { %3576 = vrcp.f32 %v1749_v12 }
0x2572   :  { %v3577_v53 = vpop.eup %3576 }
0x2573   :  { %v1753_v18 = vmul.f32 %v3577_v53, %v4103_v9 }
0x25d6   :  { %v1756_v13 = vpop.permute.xlu0 %1755 }
0x25d7   :  { %v1758_v16 = vmul.f32 %v3577_v53, %v1756_v13 }
0x25d9   :  { %1760 = vrot.lane.b32.xlu1 %v1758_v16, %s3792_s18 }
0x264b   :  { %v1761_v20 = vpop.permute.xlu1 %1760 }
0x264c   :  { %v4145_v25 = vadd.f32 %v1761_v20, %v1753_v18 }
0x264e   :  { %3578 = vtanh.f32 %v4145_v25 }
0x2658   :  { %v3579_v3 = vpop.eup %3578 }
0x2659   :  { %1766 = vrot.lane.b32.xlu1 %v3579_v3, %s3791_s3 }
0x26cb   :  { %v1767_v27 = vpop.permute.xlu1 %1766 }
0x26cc   :  { %v1769_v30 = vmul.f32 %v3577_v53, %v1767_v27 }
0x26ce   :  { %v1774_v31 = vrot.slane %v1769_v30, %v4006_v63 }
0x26d0   :  { %1775 = vrot.lane.b32.xlu0 %v1774_v31, %s3792_s18 }
0x2742   :  { %v1776_v32 = vpop.permute.xlu0 %1775 }
0x2743   :  { %3015 = vmatmul.mubr.msk.f32.vlgmr.msra.gmra.mrb[14].mxu1 %vm92_vm1, %v1776_v32  ;;  %3239 = vmatmul.mubr.msk.f32.vlgmr.msra.gmra.mrb[16].mxu0 %vm92_vm1, %v1776_v32 }
0x2744   :  { %3400 = vmatpush1.bf16.msra.mxu1 %v3967_v33  ;;  %3407 = vmatpush3.bf16.msra.mxu0 %v3993_v57 }
0x2745   :  { %3402 = vmatprep.subr.bf16.mxu1 %v3969_v34  ;;  %3408 = vmatprep.subr.bf16.mxu0 %v3788_v0 }
0x2746   :  { %2094 = vmatprep.mubr.f32.mxu1 %v3790_v1  ;;  %3249 = vmatprep.mubr.msk.f32.mxu0 %vm3789_vm0, %v3790_v1 }
0x2748   :  { %3404 = vmatpush1.bf16.msra.mxu1 %v3974_v37  ;;  %3410 = vmatpush3.bf16.msra.mxu0 %v3996_v59 }
0x2749   :  { %3412 = vmatprep.subr.bf16.mxu1 %v3965_v29  ;;  %3419 = vmatprep.subr.bf16.mxu0 %v3788_v0 }
0x2816   :  { %v1845_v9 = vpop.f32.mrb[14].mxu1  ;;  %v1916_v36 = vpop.f32.mrb[16].mxu0 }
0x2817   :  { %v4165_v38 = vadd.f32 %v1916_v36, %v4027_v10  ;;  %v1847_v39 = vpop.f32.mrb[15].mxu1  ;;  %v3240_v40 = vpop.f32.mrb[17].mxu0 }
0x2818   :  { %v4168_v41 = vadd.f32 %v1847_v39, %v4030_v11 }
0x2819   :  { %v1923_v42 = vsel %vm1165_vm2, %v4165_v38, -inf }
0x281a   :  { %v1922_v43 = vsel %vm1165_vm2, %v4168_v41, -inf }
0x281b   :  { %v1924_v44 = vmax.f32 %v1922_v43, %v1923_v42 }
0x281d   :  { %1925 = vmax.xlane.f32.xlu1 %v1924_v44 }
0x28aa   :  { %v4174_v45 = vpop.xlane.xlu1 %1925 }
0x28ab   :  { %vm1927_vm11 = vcmp.ge.f32.partialorder %v4168_v41, %v4174_v45  ;;  %vm1928_vm12 = vcmp.ge.f32.partialorder %v4165_v38, %v4174_v45 }
0x28ac   :  { %v1929_v5 = vsel %vm1927_vm11, %v4043_v21, 255  ;;  %v1930_v46 = vsel %vm1928_vm12, %v4046_v22, 255 }
0x28ad   :  { %v1931_v47 = vsel %vm1165_vm2, %v1929_v5, 2147483647  ;;  %v1932_v48 = vsel %vm1165_vm2, %v1930_v46, 2147483647 }
0x28ae   :  { %vm1933_vm13 = vcmp.lt.s32.totalorder %v1931_v47, %v1932_v48 }
0x28af   :  { %v1934_v7 = vsel %vm1933_vm13, %v1931_v47, %v1932_v48 }
0x28b0   :  { %v1936_v49 = vshra.s32 %v1934_v7, 16  ;;  %v1935_v51 = vand.u32 65535, %v1934_v7 }
0x28b2   :  { %v1938_v50 = vcvt.s32.f32 %v1936_v49  ;;  %v1937_v54 = vcvt.s32.f32 %v1935_v51 }
0x28b4   :  { %1939 = vmin.xlane.f32.xlu0 %v1938_v50 }
0x2941   :  { %v1940_v52 = vpop.xlane.xlu0 %1939 }
0x2942   :  { %vm1941_vm14 = vcmp.eq.f32.partialorder %v1938_v50, %v1940_v52  ;;  %v1946_v56 = vcvt.f32.s32 %v1940_v52 }
0x2943   :  { %v1942_v55 = vsel %vm1941_vm14, %v1937_v54, inf }
0x2944   :  { %1943 = vmin.xlane.f32.xlu0 %v1942_v55  ;;  %v1947_v60 = vshll.u32 %v1946_v56, 16 }
0x29d1   :  { %v1944_v58 = vpop.xlane.xlu0 %1943 }
0x29d2   :  { %v1945_v2 = vcvt.f32.s32 %v1944_v58 }
0x29d4   :  { %v1948_v4 = vadd.s32 %v1947_v60, %v1945_v2 }
0x29d6   :  { %v1949_v6 = vrot.slane %v1948_v4, 4 }
0x29d8   :  { %vm1950_vm15 = vcmp.lt.s32.totalorder %v1948_v4, %v1949_v6 }
0x29d9   :  { %v1951_v8 = vsel %vm1950_vm15, %v1948_v4, %v1949_v6 }
0x29da   :  { %v1952_v12 = vrot.slane %v1951_v8, 2 }
0x29dc   :  { %vm1953_vm3 = vcmp.lt.s32.totalorder %v1951_v8, %v1952_v12 }
0x29dd   :  { %v1954_v53 = vsel %vm1953_vm3, %v1951_v8, %v1952_v12 }
0x29de   :  { %v1955_v13 = vrot.slane %v1954_v53, 1 }
0x29e0   :  { %vm1956_vm4 = vcmp.lt.s32.totalorder %v1954_v53, %v1955_v13 }
0x29e1   :  { %v1957_v16 = vsel %vm1956_vm4, %v1954_v53, %v1955_v13 }
0x29e2   :  { %3459 = vpush %v1957_v16 }
0x2a13   :  { %s3460_s26 = spop %3459 }
0x2a14   :  { %s1959_s27 = scalar_lea.vmem [#allocation5], %s3460_s26 }
0x2a15   :  { %v1960_v18 = vld [vmem:[%s1959_s27] sm:$0x1] }
0x2a16   :  { %v1996_v20 = vadd.f32 %v1960_v18, %v1845_v9 }
0x2a18   :  { %3580 = vtanh.f32 %v1996_v20  ;;  %v3017_v27 = vmul.f32 -1.442695, %v1996_v20 }
0x2a1a   :  { %3582 = vpow2.f32 %v3017_v27 }
0x2a22   :  { %v3581_v3 = vpop.eup %3580 }
0x2a23   :  { %2006 = vrot.lane.b32.xlu1 %v3581_v3, %s3791_s3 }
0x2a24   :  { %v3583_v30 = vpop.eup %3582 }
0x2a25   :  { %v2000_v31 = vadd.f32 1.0, %v3583_v30 }
0x2a27   :  { %3584 = vrcp.f32 %v2000_v31 }
0x2a31   :  { %v3585_v32 = vpop.eup %3584 }
0x2a32   :  { %v2004_v40 = vmul.f32 %v3585_v32, %v4145_v25 }
0x2a95   :  { %v2007_v36 = vpop.permute.xlu1 %2006 }
0x2a96   :  { %v2009_v39 = vmul.f32 %v3585_v32, %v2007_v36 }
0x2a98   :  { %2011 = vrot.lane.b32.xlu0 %v2009_v39, %s3792_s18 }
0x2b0a   :  { %v2012_v42 = vpop.permute.xlu0 %2011 }
0x2b0b   :  { %v4187_v43 = vadd.f32 %v2012_v42, %v2004_v40 }
0x2b0d   :  { %3586 = vtanh.f32 %v4187_v43 }
0x2b17   :  { %v3587_v9 = vpop.eup %3586 }
0x2b18   :  { %2017 = vrot.lane.b32.xlu1 %v3587_v9, %s3791_s3 }
0x2b8a   :  { %v2018_v44 = vpop.permute.xlu1 %2017 }
0x2b8b   :  { %v2020_v5 = vmul.f32 %v3585_v32, %v2018_v44 }
0x2b8d   :  { %v2025_v46 = vrot.slane %v2020_v5, %v4006_v63 }
0x2b8f   :  { %2026 = vrot.lane.b32.xlu1 %v2025_v46, %s3792_s18 }
0x2c01   :  { %v2027_v47 = vpop.permute.xlu1 %2026 }
0x2c02   :  { %3018 = vmatmul.mubr.msk.f32.vlgmr.msra.gmra.mrb[16].mxu1 %vm92_vm1, %v2027_v47  ;;  %3250 = vmatmul.mubr.msk.f32.vlgmr.msra.gmra.mrb[18].mxu0 %vm92_vm1, %v2027_v47 }
0x2c03   :  { %3414 = vmatpush1.bf16.msra.mxu1 %v3967_v33  ;;  %3421 = vmatpush3.bf16.msra.mxu0 %v3993_v57 }
0x2c04   :  { %3416 = vmatprep.subr.bf16.mxu1 %v3969_v34  ;;  %3422 = vmatprep.subr.bf16.mxu0 %v3788_v0 }
0x2c05   :  { %2345 = vmatprep.mubr.f32.mxu1 %v3790_v1  ;;  %3260 = vmatprep.mubr.msk.f32.mxu0 %vm3789_vm0, %v3790_v1 }
0x2c07   :  { %3418 = vmatpush1.bf16.msra.mxu1 %v3974_v37  ;;  %3424 = vmatpush3.bf16.msra.mxu0 %v3996_v59 }
0x2c08   :  { %3426 = vmatprep.subr.bf16.mxu1 %v3965_v29  ;;  %3433 = vmatprep.subr.bf16.mxu0 %v3788_v0 }
0x2cd5   :  { %v2096_v25 = vpop.f32.mrb[16].mxu1  ;;  %v2167_v48 = vpop.f32.mrb[18].mxu0 }
0x2cd6   :  { %v4207_v7 = vadd.f32 %v2167_v48, %v4027_v10  ;;  %v2098_v49 = vpop.f32.mrb[17].mxu1  ;;  %v3251_v50 = vpop.f32.mrb[19].mxu0 }
0x2cd7   :  { %v4210_v51 = vadd.f32 %v2098_v49, %v4030_v11 }
0x2cd8   :  { %v2174_v52 = vsel %vm1165_vm2, %v4207_v7, -inf }
0x2cd9   :  { %v2173_v54 = vsel %vm1165_vm2, %v4210_v51, -inf }
0x2cda   :  { %v2175_v55 = vmax.f32 %v2173_v54, %v2174_v52 }
0x2cdc   :  { %2176 = vmax.xlane.f32.xlu0 %v2175_v55 }
0x2d69   :  { %v4216_v56 = vpop.xlane.xlu0 %2176 }
0x2d6a   :  { %vm2178_vm5 = vcmp.ge.f32.partialorder %v4210_v51, %v4216_v56  ;;  %vm2179_vm6 = vcmp.ge.f32.partialorder %v4207_v7, %v4216_v56 }
0x2d6b   :  { %v2180_v58 = vsel %vm2178_vm5, %v4043_v21, 255  ;;  %v2181_v60 = vsel %vm2179_vm6, %v4046_v22, 255 }
0x2d6c   :  { %v2182_v2 = vsel %vm1165_vm2, %v2180_v58, 2147483647  ;;  %v2183_v4 = vsel %vm1165_vm2, %v2181_v60, 2147483647 }
0x2d6d   :  { %vm2184_vm7 = vcmp.lt.s32.totalorder %v2182_v2, %v2183_v4 }
0x2d6e   :  { %v2185_v6 = vsel %vm2184_vm7, %v2182_v2, %v2183_v4 }
0x2d6f   :  { %v2187_v8 = vshra.s32 %v2185_v6, 16  ;;  %v2186_v53 = vand.u32 65535, %v2185_v6 }
0x2d71   :  { %v2189_v12 = vcvt.s32.f32 %v2187_v8  ;;  %v2188_v16 = vcvt.s32.f32 %v2186_v53 }
0x2d73   :  { %2190 = vmin.xlane.f32.xlu1 %v2189_v12 }
0x2e00   :  { %v2191_v13 = vpop.xlane.xlu1 %2190 }
0x2e01   :  { %vm2192_vm8 = vcmp.eq.f32.partialorder %v2189_v12, %v2191_v13  ;;  %v2197_v20 = vcvt.f32.s32 %v2191_v13 }
0x2e02   :  { %v2193_v18 = vsel %vm2192_vm8, %v2188_v16, inf }
0x2e03   :  { %2194 = vmin.xlane.f32.xlu0 %v2193_v18  ;;  %v2198_v27 = vshll.u32 %v2197_v20, 16 }
0x2e90   :  { %v2195_v3 = vpop.xlane.xlu0 %2194 }
0x2e91   :  { %v2196_v30 = vcvt.f32.s32 %v2195_v3 }
0x2e93   :  { %v2199_v31 = vadd.s32 %v2198_v27, %v2196_v30 }
0x2e95   :  { %v2200_v32 = vrot.slane %v2199_v31, 4 }
0x2e97   :  { %vm2201_vm9 = vcmp.lt.s32.totalorder %v2199_v31, %v2200_v32 }
0x2e98   :  { %v2202_v36 = vsel %vm2201_vm9, %v2199_v31, %v2200_v32 }
0x2e99   :  { %v2203_v39 = vrot.slane %v2202_v36, 2 }
0x2e9b   :  { %vm2204_vm10 = vcmp.lt.s32.totalorder %v2202_v36, %v2203_v39 }
0x2e9c   :  { %v2205_v40 = vsel %vm2204_vm10, %v2202_v36, %v2203_v39 }
0x2e9d   :  { %v2206_v42 = vrot.slane %v2205_v40, 1 }
0x2e9f   :  { %vm2207_vm11 = vcmp.lt.s32.totalorder %v2205_v40, %v2206_v42 }
0x2ea0   :  { %v2208_v9 = vsel %vm2207_vm11, %v2205_v40, %v2206_v42 }
0x2ea1   :  { %3461 = vpush %v2208_v9 }
0x2ed2   :  { %s3462_s0 = spop %3461 }
0x2ed3   :  { %s2210_s28 = scalar_lea.vmem [#allocation5], %s3462_s0 }
0x2ed4   :  { %v2211_v44 = vld [vmem:[%s2210_s28] sm:$0x1] }
0x2ed5   :  { %v2247_v5 = vadd.f32 %v2211_v44, %v2096_v25 }
0x2ed7   :  { %3588 = vtanh.f32 %v2247_v5  ;;  %v3020_v47 = vmul.f32 -1.442695, %v2247_v5 }
0x2ed9   :  { %3590 = vpow2.f32 %v3020_v47 }
0x2ee1   :  { %v3589_v46 = vpop.eup %3588 }
0x2ee2   :  { %2257 = vrot.lane.b32.xlu0 %v3589_v46, %s3791_s3 }
0x2ee3   :  { %v3591_v48 = vpop.eup %3590 }
0x2ee4   :  { %v2251_v49 = vadd.f32 1.0, %v3591_v48 }
0x2ee6   :  { %3592 = vrcp.f32 %v2251_v49 }
0x2ef0   :  { %v3593_v50 = vpop.eup %3592 }
0x2ef1   :  { %v2255_v55 = vmul.f32 %v3593_v50, %v4187_v43 }
0x2f54   :  { %v2258_v52 = vpop.permute.xlu0 %2257 }
0x2f55   :  { %v2260_v54 = vmul.f32 %v3593_v50, %v2258_v52 }
0x2f57   :  { %2262 = vrot.lane.b32.xlu1 %v2260_v54, %s3792_s18 }
0x2fc9   :  { %v2263_v58 = vpop.permute.xlu1 %2262 }
0x2fca   :  { %v4229_v60 = vadd.f32 %v2263_v58, %v2255_v55 }
0x2fcc   :  { %3594 = vtanh.f32 %v4229_v60 }
0x2fd6   :  { %v3595_v25 = vpop.eup %3594 }
0x2fd7   :  { %2268 = vrot.lane.b32.xlu1 %v3595_v25, %s3791_s3 }
0x3049   :  { %v2269_v2 = vpop.permute.xlu1 %2268 }
0x304a   :  { %v2271_v4 = vmul.f32 %v3593_v50, %v2269_v2 }
0x304c   :  { %v2276_v6 = vrot.slane %v2271_v4, %v4006_v63 }
0x304e   :  { %2277 = vrot.lane.b32.xlu0 %v2276_v6, %s3792_s18 }
0x30c0   :  { %v2278_v8 = vpop.permute.xlu0 %2277 }
0x30c1   :  { %3021 = vmatmul.mubr.msk.f32.vlgmr.msra.gmra.mrb[18].mxu1 %vm92_vm1, %v2278_v8  ;;  %3261 = vmatmul.mubr.msk.f32.vlgmr.msra.gmra.mrb[20].mxu0 %vm92_vm1, %v2278_v8 }
0x30c2   :  { %3428 = vmatpush1.bf16.msra.mxu1 %v3967_v33  ;;  %3435 = vmatpush3.bf16.msra.mxu0 %v3993_v57 }
0x30c3   :  { %3430 = vmatprep.subr.bf16.mxu1 %v3969_v34  ;;  %3436 = vmatprep.subr.bf16.mxu0 %v3788_v0 }
0x30c4   :  { %2596 = vmatprep.mubr.f32.mxu1 %v3790_v1  ;;  %3271 = vmatprep.mubr.msk.f32.mxu0 %vm3789_vm0, %v3790_v1 }
0x30c6   :  { %3432 = vmatpush1.bf16.msra.mxu1 %v3974_v37  ;;  %3438 = vmatpush3.bf16.msra.mxu0 %v3996_v59 }
0x30c7   :  { %3440 = vmatprep.subr.bf16.mxu1 %v3965_v29  ;;  %3447 = vmatprep.subr.bf16.mxu0 %v3788_v0 }
0x3194   :  { %v2347_v43 = vpop.f32.mrb[18].mxu1  ;;  %v2418_v12 = vpop.f32.mrb[20].mxu0 }
0x3195   :  { %v4249_v53 = vadd.f32 %v2418_v12, %v4027_v10  ;;  %v2349_v13 = vpop.f32.mrb[19].mxu1  ;;  %v3262_v16 = vpop.f32.mrb[21].mxu0 }
0x3196   :  { %v4252_v18 = vadd.f32 %v2349_v13, %v4030_v11 }
0x3197   :  { %v2425_v20 = vsel %vm1165_vm2, %v4249_v53, -inf }
0x3198   :  { %v2424_v3 = vsel %vm1165_vm2, %v4252_v18, -inf }
0x3199   :  { %v2426_v27 = vmax.f32 %v2424_v3, %v2425_v20 }
0x319b   :  { %2427 = vmax.xlane.f32.xlu1 %v2426_v27 }
0x3228   :  { %v4258_v29 = vpop.xlane.xlu1 %2427 }
0x3229   :  { %vm2429_vm12 = vcmp.ge.f32.partialorder %v4252_v18, %v4258_v29  ;;  %vm2430_vm13 = vcmp.ge.f32.partialorder %v4249_v53, %v4258_v29 }
0x322a   :  { %v2431_v30 = vsel %vm2429_vm12, %v4043_v21, 255  ;;  %v2432_v31 = vsel %vm2430_vm13, %v4046_v22, 255 }
0x322b   :  { %v2433_v32 = vsel %vm1165_vm2, %v2431_v30, 2147483647  ;;  %v2434_v36 = vsel %vm1165_vm2, %v2432_v31, 2147483647 }
0x322c   :  { %vm2435_vm14 = vcmp.lt.s32.totalorder %v2433_v32, %v2434_v36 }
0x322d   :  { %v2436_v39 = vsel %vm2435_vm14, %v2433_v32, %v2434_v36 }
0x322e   :  { %v2438_v40 = vshra.s32 %v2436_v39, 16  ;;  %v2437_v9 = vand.u32 65535, %v2436_v39 }
0x3230   :  { %v2440_v42 = vcvt.s32.f32 %v2438_v40  ;;  %v2439_v5 = vcvt.s32.f32 %v2437_v9 }
0x3232   :  { %2441 = vmin.xlane.f32.xlu0 %v2440_v42 }
0x32bf   :  { %v2442_v44 = vpop.xlane.xlu0 %2441 }
0x32c0   :  { %vm2443_vm15 = vcmp.eq.f32.partialorder %v2440_v42, %v2442_v44  ;;  %v2448_v47 = vcvt.f32.s32 %v2442_v44 }
0x32c1   :  { %v2444_v46 = vsel %vm2443_vm15, %v2439_v5, inf }
0x32c2   :  { %2445 = vmin.xlane.f32.xlu0 %v2444_v46  ;;  %v2449_v49 = vshll.u32 %v2448_v47, 16 }
0x334f   :  { %v2446_v48 = vpop.xlane.xlu0 %2445 }
0x3350   :  { %v2447_v50 = vcvt.f32.s32 %v2446_v48 }
0x3352   :  { %v2450_v52 = vadd.s32 %v2449_v49, %v2447_v50 }
0x3354   :  { %v2451_v54 = vrot.slane %v2450_v52, 4 }
0x3356   :  { %vm2452_vm3 = vcmp.lt.s32.totalorder %v2450_v52, %v2451_v54 }
0x3357   :  { %v2453_v55 = vsel %vm2452_vm3, %v2450_v52, %v2451_v54 }
0x3358   :  { %v2454_v58 = vrot.slane %v2453_v55, 2 }
0x335a   :  { %vm2455_vm4 = vcmp.lt.s32.totalorder %v2453_v55, %v2454_v58 }
0x335b   :  { %v2456_v25 = vsel %vm2455_vm4, %v2453_v55, %v2454_v58 }
0x335c   :  { %v2457_v2 = vrot.slane %v2456_v25, 1 }
0x335e   :  { %vm2458_vm5 = vcmp.lt.s32.totalorder %v2456_v25, %v2457_v2 }
0x335f   :  { %v2459_v4 = vsel %vm2458_vm5, %v2456_v25, %v2457_v2 }
0x3360   :  { %3463 = vpush %v2459_v4 }
0x3391   :  { %s3464_s29 = spop %3463 }
0x3392   :  { %s2461_s30 = scalar_lea.vmem [#allocation5], %s3464_s29 }
0x3393   :  { %v2462_v6 = vld [vmem:[%s2461_s30] sm:$0x1] }
0x3394   :  { %v2498_v8 = vadd.f32 %v2462_v6, %v2347_v43 }
0x3396   :  { %3596 = vtanh.f32 %v2498_v8  ;;  %v3023_v13 = vmul.f32 -1.442695, %v2498_v8 }
0x3398   :  { %3598 = vpow2.f32 %v3023_v13 }
0x33a0   :  { %v3597_v12 = vpop.eup %3596 }
0x33a1   :  { %2508 = vrot.lane.b32.xlu1 %v3597_v12, %s3791_s3 }
0x33a2   :  { %v3599_v16 = vpop.eup %3598 }
0x33a3   :  { %v2502_v20 = vadd.f32 1.0, %v3599_v16 }
0x33a5   :  { %3600 = vrcp.f32 %v2502_v20 }
0x33af   :  { %v3601_v3 = vpop.eup %3600 }
0x33b0   :  { %v2506_v31 = vmul.f32 %v3601_v3, %v4229_v60 }
0x3413   :  { %v2509_v27 = vpop.permute.xlu1 %2508 }
0x3414   :  { %v2511_v30 = vmul.f32 %v3601_v3, %v2509_v27 }
0x3416   :  { %2513 = vrot.lane.b32.xlu0 %v2511_v30, %s3792_s18 }
0x3488   :  { %v2514_v32 = vpop.permute.xlu0 %2513 }
0x3489   :  { %v4271_v36 = vadd.f32 %v2514_v32, %v2506_v31 }
0x348b   :  { %3602 = vtanh.f32 %v4271_v36 }
0x3495   :  { %v3603_v43 = vpop.eup %3602 }
0x3496   :  { %2519 = vrot.lane.b32.xlu1 %v3603_v43, %s3791_s3 }
0x3508   :  { %v2520_v39 = vpop.permute.xlu1 %2519 }
0x3509   :  { %v2522_v40 = vmul.f32 %v3601_v3, %v2520_v39 }
0x350b   :  { %v2527_v42 = vrot.slane %v2522_v40, %v4006_v63 }
0x350d   :  { %2528 = vrot.lane.b32.xlu1 %v2527_v42, %s3792_s18 }
0x357f   :  { %v2529_v9 = vpop.permute.xlu1 %2528 }
0x3580   :  { %3024 = vmatmul.mubr.msk.f32.vlgmr.msra.gmra.mrb[20].mxu1 %vm92_vm1, %v2529_v9  ;;  %3272 = vmatmul.mubr.msk.f32.vlgmr.msra.gmra.mrb[22].mxu0 %vm92_vm1, %v2529_v9 }
0x3581   :  { %3442 = vmatpush1.bf16.msra.mxu1 %v3967_v33  ;;  %3449 = vmatpush3.bf16.msra.mxu0 %v3993_v57 }
0x3582   :  { %3444 = vmatprep.subr.bf16.mxu1 %v3969_v34  ;;  %3450 = vmatprep.subr.bf16.mxu0 %v3788_v0 }
0x3583   :  { %2847 = vmatprep.mubr.f32.mxu1 %v3790_v1  ;;  %3282 = vmatprep.mubr.msk.f32.mxu0 %vm3789_vm0, %v3790_v1 }
0x3585   :  { %3446 = vmatpush1.bf16.msra.mxu1 %v3974_v37  ;;  %3452 = vmatpush3.bf16.msra.mxu0 %v3996_v59 }
0x3653   :  { %v2598_v60 = vpop.f32.mrb[20].mxu1  ;;  %v2669_v44 = vpop.f32.mrb[22].mxu0 }
0x3654   :  { %v4289_v5 = vadd.f32 %v2669_v44, %v4027_v10  ;;  %v2600_v33 = vpop.f32.mrb[21].mxu1  ;;  %v3273_v57 = vpop.f32.mrb[23].mxu0 }
0x3655   :  { %v4292_v34 = vadd.f32 %v2600_v33, %v4030_v11 }
0x3656   :  { %v2676_v0 = vsel %vm1165_vm2, %v4289_v5, -inf }
0x3657   :  { %v2675_v1 = vsel %vm1165_vm2, %v4292_v34, -inf }
0x3658   :  { %v2677_v46 = vmax.f32 %v2675_v1, %v2676_v0 }
0x365a   :  { %2678 = vmax.xlane.f32.xlu0 %v2677_v46 }
0x36e7   :  { %v4298_v37 = vpop.xlane.xlu0 %2678 }
0x36e8   :  { %vm2680_vm0 = vcmp.ge.f32.partialorder %v4292_v34, %v4298_v37  ;;  %vm2681_vm6 = vcmp.ge.f32.partialorder %v4289_v5, %v4298_v37 }
0x36e9   :  { %v2682_v59 = vsel %vm2680_vm0, %v4043_v21, 255  ;;  %v2683_v47 = vsel %vm2681_vm6, %v4046_v22, 255 }
0x36ea   :  { %v2684_v48 = vsel %vm1165_vm2, %v2682_v59, 2147483647  ;;  %v2685_v49 = vsel %vm1165_vm2, %v2683_v47, 2147483647  ;;  %v1205_v47 = vsub.f32 %v4036_v17, %v4048_v23  ;;  %v1962_v17 = vsub.f32 %v4165_v38, %v4174_v45 }
0x36eb   :  { %vm2686_vm7 = vcmp.lt.s32.totalorder %v2684_v48, %v2685_v49 }
0x36ec   :  { %v2687_v50 = vsel %vm2686_vm7, %v2684_v48, %v2685_v49  ;;  %v1206_v48 = vsub.f32 %v4033_v14, %v4048_v23  ;;  %v1207_v49 = vmul.f32 1.442695, %v1205_v47  ;;  %v2463_v23 = vsub.f32 %v4252_v18, %v4258_v29 }
0x36ed   :  { %v2689_v52 = vshra.s32 %v2687_v50, 16  ;;  %v2688_v55 = vand.u32 65535, %v2687_v50 }
0x36ee   :  { %v1209_v50 = vmul.f32 1.442695, %v1206_v48 }
0x36ef   :  { %v2691_v54 = vcvt.s32.f32 %v2689_v52  ;;  %v2690_v25 = vcvt.s32.f32 %v2688_v55  ;;  %v1460_v52 = vsub.f32 %v4081_v15, %v4090_v26  ;;  %v2464_v15 = vsub.f32 %v4249_v53, %v4258_v29 }
0x36f1   :  { %2692 = vmin.xlane.f32.xlu1 %v2691_v54  ;;  %v1463_v55 = vmul.f32 1.442695, %v1460_v52 }
0x377e   :  { %v2693_v58 = vpop.xlane.xlu1 %2692 }
0x377f   :  { %vm2694_vm8 = vcmp.eq.f32.partialorder %v2691_v54, %v2693_v58  ;;  %v2699_v4 = vcvt.f32.s32 %v2693_v58  ;;  %v2467_v58 = vmul.f32 1.442695, %v2464_v15 }
0x3780   :  { %v2695_v2 = vsel %vm2694_vm8, %v2690_v25, inf }
0x3781   :  { %2696 = vmin.xlane.f32.xlu0 %v2695_v2  ;;  %v2700_v21 = vshll.u32 %v2699_v4, 16 }
0x380e   :  { %v2697_v6 = vpop.xlane.xlu0 %2696 }
0x380f   :  { %v2698_v8 = vcvt.f32.s32 %v2697_v6 }
0x3811   :  { %v2701_v22 = vadd.s32 %v2700_v21, %v2698_v8 }
0x3813   :  { %v2702_v12 = vrot.slane %v2701_v22, 4 }
0x3815   :  { %vm2703_vm9 = vcmp.lt.s32.totalorder %v2701_v22, %v2702_v12 }
0x3816   :  { %v2704_v13 = vsel %vm2703_vm9, %v2701_v22, %v2702_v12 }
0x3817   :  { %v2705_v16 = vrot.slane %v2704_v13, 2 }
0x3819   :  { %vm2706_vm10 = vcmp.lt.s32.totalorder %v2704_v13, %v2705_v16 }
0x381a   :  { %v2707_v20 = vsel %vm2706_vm10, %v2704_v13, %v2705_v16 }
0x381b   :  { %v2708_v3 = vrot.slane %v2707_v20, 1 }
0x381d   :  { %vm2709_vm11 = vcmp.lt.s32.totalorder %v2707_v20, %v2708_v3 }
0x381e   :  { %v2710_v27 = vsel %vm2709_vm11, %v2707_v20, %v2708_v3 }
0x381f   :  { %3465 = vpush %v2710_v27 }
0x3850   :  { %s3466_s6 = spop %3465 }
0x3851   :  { %s2712_s7 = scalar_lea.vmem [#allocation5], %s3466_s6 }
0x3852   :  { %v2713_v30 = vld [vmem:[%s2712_s7] sm:$0x1] }
0x3853   :  { %v2749_v31 = vadd.f32 %v2713_v30, %v2598_v60 }
0x3855   :  { %3604 = vtanh.f32 %v2749_v31  ;;  %v3026_v43 = vmul.f32 -1.442695, %v2749_v31 }
0x3857   :  { %3606 = vpow2.f32 %v3026_v43  ;;  %v3793_v43 = vmov 1966171168  }
0x385f   :  { %v3605_v32 = vpop.eup %3604 }
0x3860   :  { %2759 = vrot.lane.b32.xlu0 %v3605_v32, %s3791_s3 }
0x3861   :  { %v3607_v39 = vpop.eup %3606 }
0x3862   :  { %v2753_v40 = vadd.f32 1.0, %v3607_v39  ;;  %v1223_v39 = vunpack.c.l.s4 %v3793_v43 }
0x3864   :  { %3608 = vrcp.f32 %v2753_v40 }
0x386e   :  { %v3609_v42 = vpop.eup %3608 }
0x386f   :  { %v2757_v33 = vmul.f32 %v3609_v42, %v4271_v36  ;;  %v1459_v36 = vsub.f32 %v4084_v19, %v4090_v26  ;;  %v1965_v19 = vmul.f32 1.442695, %v1962_v17  ;;  %v2465_v26 = vmul.f32 1.442695, %v2463_v23 }
0x3871   :  { %v1461_v54 = vmul.f32 1.442695, %v1459_v36 }
0x38d2   :  { %v2760_v9 = vpop.permute.xlu0 %2759 }
0x38d3   :  { %v2762_v44 = vmul.f32 %v3609_v42, %v2760_v9 }
0x38d5   :  { %2764 = vrot.lane.b32.xlu1 %v2762_v44, %s3792_s18 }
0x3947   :  { %v2765_v57 = vpop.permute.xlu1 %2764 }
0x3948   :  { %v2767_v0 = vadd.f32 %v2765_v57, %v2757_v33 }
0x394a   :  { %3610 = vtanh.f32 %v2767_v0 }
0x394b   :  { %3612 = vpow2.f32 %v1207_v49 }
0x394c   :  { %3614 = vpow2.f32 %v1209_v50 }
0x394d   :  { %3616 = vpow2.f32 %v1461_v54 }
0x394e   :  { %3618 = vpow2.f32 %v1463_v55 }
0x3954   :  { %v3611_v60 = vpop.eup %3610 }
0x3955   :  { %2770 = vrot.lane.b32.xlu1 %v3611_v60, %s3791_s3 }
0x39c7   :  { %v2771_v1 = vpop.permute.xlu1 %2770 }
0x39c8   :  { %v2773_v46 = vmul.f32 %v3609_v42, %v2771_v1  ;;  %v1224_v42 = vunpack.c.0.s8 %v1223_v39 }
0x39ca   :  { %v2778_v59 = vrot.slane %v2773_v46, %v4006_v63  ;;  %v1961_v63 = vsub.f32 %v4168_v41, %v4174_v45  ;;  %v3613_v41 = vpop.eup %3612  ;;  %v4341_v33 = vsub.s32 %v1224_v42, %v4003_v62 }
0x39cb   :  { %v3615_v25 = vpop.eup %3614  ;;  %v1211_v38 = vsel %vm1165_vm2, %v3613_v41, 0.0 }
0x39cc   :  { %2779 = vrot.lane.b32.xlu0 %v2778_v59, %s3792_s18  ;;  %v1963_v14 = vmul.f32 1.442695, %v1961_v63  ;;  %v3617_v2 = vpop.eup %3616  ;;  %v1212_v45 = vsel %vm1165_vm2, %v3615_v25, 0.0 }
0x39cd   :  { %v3619_v4 = vpop.eup %3618  ;;  %v1213_v18 = vadd.f32 %v1212_v45, %v1211_v38  ;;  %v1465_v21 = vsel %vm1165_vm2, %v3617_v2, 0.0  ;;  %v2212_v45 = vsub.f32 %v4210_v51, %v4216_v56 }
0x39ce   :  { %3620 = vpow2.f32 %v1963_v14  ;;  %v1466_v53 = vsel %vm1165_vm2, %v3619_v4, 0.0 }
0x39cf   :  { %3622 = vpow2.f32 %v1965_v19  ;;  %v1467_v8 = vadd.f32 %v1466_v53, %v1465_v21  ;;  %v2714_v21 = vsub.f32 %v4292_v34, %v4298_v37 }
0x39d0   :  { %3624 = vpow2.f32 %v2465_v26 }
0x39d1   :  { %3626 = vpow2.f32 %v2467_v58 }
0x39d8   :  { %v3621_v6 = vpop.eup %3620 }
0x39d9   :  { %v3623_v29 = vpop.eup %3622  ;;  %v1967_v12 = vsel %vm1165_vm2, %v3621_v6, 0.0 }
0x39da   :  { %v3625_v22 = vpop.eup %3624  ;;  %v1968_v13 = vsel %vm1165_vm2, %v3623_v29, 0.0 }
0x39db   :  { %v3627_v16 = vpop.eup %3626  ;;  %v1969_v20 = vadd.f32 %v1968_v13, %v1967_v12  ;;  %v2469_v3 = vsel %vm1165_vm2, %v3625_v22, 0.0 }
0x39dc   :  { %v2470_v27 = vsel %vm1165_vm2, %v3627_v16, 0.0 }
0x39dd   :  { %v2471_v30 = vadd.f32 %v2470_v27, %v2469_v3 }
0x39eb   :  { %1214 = vadd.xlane.f32.xlu0 %v1213_v18  ;;  %v2213_v18 = vsub.f32 %v4207_v7, %v4216_v56 }
0x39ed   :  { %v2216_v53 = vmul.f32 1.442695, %v2213_v18 }
0x39ef   :  { %1468 = vadd.xlane.f32.xlu0 %v1467_v8 }
0x39f3   :  { %1970 = vadd.xlane.f32.xlu0 %v1969_v20 }
0x39f7   :  { %2472 = vadd.xlane.f32.xlu0 %v2471_v30 }
0x3a3e   :  { %v2780_v31 = vpop.permute.xlu0 %2779 }
0x3a3f   :  { %3027 = vmatmul.mubr.msk.f32.vlgmr.msra.gmra.mrb[22].mxu1 %vm92_vm1, %v2780_v31  ;;  %3283 = vmatmul.mubr.msk.f32.vlgmr.msra.gmra.mrb[24].mxu0 %vm92_vm1, %v2780_v31  ;;  %vm4345_vm1 = vcmp.lt.s32.totalorder %v974_v61, 256 }
0x3a78   :  { %v1215_v32 = vpop.xlane.xlu0 %1214 }
0x3a79   :  { %3628 = vrcp.f32 %v1215_v32 }
0x3a7c   :  { %v1469_v40 = vpop.xlane.xlu0 %1468 }
0x3a7d   :  { %3630 = vrcp.f32 %v1469_v40 }
0x3a80   :  { %v1971_v9 = vpop.xlane.xlu0 %1970 }
0x3a81   :  { %3632 = vrcp.f32 %v1971_v9 }
0x3a83   :  { %v3629_v44 = vpop.eup %3628 }
0x3a84   :  { %v1217_v57 = vmul.f32 %v3629_v44, %v3613_v41  ;;  %v1218_v0 = vmul.f32 %v3629_v44, %v3615_v25  ;;  %v2473_v60 = vpop.xlane.xlu0 %2472  ;;  %v1710_v25 = vsub.f32 %v4126_v28, %v4132_v35  ;;  %v2715_v28 = vsub.f32 %v4289_v5, %v4298_v37 }
0x3a85   :  { %3634 = vrcp.f32 %v2473_v60 }
0x3a86   :  { %v1221_v1 = vcombine.low %v1217_v57, %v1218_v0  ;;  %v1712_v38 = vmul.f32 1.442695, %v1710_v25 }
0x3a87   :  { %v3631_v46 = vpop.eup %3630 }
0x3a88   :  { %v1228_v59 = vrot.slane %v1221_v1, %v4341_v33  ;;  %v1471_v47 = vmul.f32 %v3631_v46, %v3617_v2  ;;  %v1472_v48 = vmul.f32 %v3631_v46, %v3619_v4  ;;  %v1711_v2 = vsub.f32 %v4123_v24, %v4132_v35 }
0x3a89   :  { %3636 = vpow2.f32 %v1712_v38  ;;  %v2716_v24 = vmul.f32 1.442695, %v2714_v21  ;;  %v2718_v35 = vmul.f32 1.442695, %v2715_v28 }
0x3a8a   :  { %v1235_v36 = vrot.slane %v1228_v59, %v4341_v33  ;;  %v1475_v50 = vcombine.low %v1471_v47, %v1472_v48  ;;  %v1714_v4 = vmul.f32 1.442695, %v1711_v2 }
0x3a8b   :  { %v3633_v62 = vpop.eup %3632 }
0x3a8c   :  { %1241 = vst.msk [vmem:[#allocation10] ss:$8 sm:$0x3] %vm4345_vm1, %v1235_v36  ;;  %v1482_v52 = vrot.slane %v1475_v50, %v4341_v33  ;;  %v1973_v54 = vmul.f32 %v3633_v62, %v3621_v6  ;;  %v1974_v63 = vmul.f32 %v3633_v62, %v3623_v29  ;;  %v2214_v6 = vmul.f32 1.442695, %v2212_v45 }
0x3a8d   :  { %3638 = vpow2.f32 %v1714_v4 }
0x3a8e   :  { %v1489_v55 = vrot.slane %v1482_v52, %v4341_v33  ;;  %v1977_v17 = vcombine.low %v1973_v54, %v1974_v63  ;;  %3640 = vpow2.f32 %v2214_v6 }
0x3a8f   :  { %v3635_v14 = vpop.eup %3634  ;;  %3642 = vpow2.f32 %v2216_v53 }
0x3a90   :  { %1492 = vst.msk [vmem:[#allocation10 + $0x1] ss:$8 sm:$0x3] %vm4345_vm1, %v1489_v55  ;;  %v1984_v61 = vrot.slane %v1977_v17, %v4341_v33  ;;  %v2475_v23 = vmul.f32 %v3635_v14, %v3625_v22  ;;  %v2476_v19 = vmul.f32 %v3635_v14, %v3627_v16  ;;  %3644 = vpow2.f32 %v2716_v24 }
0x3a91   :  { %3646 = vpow2.f32 %v2718_v35 }
0x3a92   :  { %v1991_v15 = vrot.slane %v1984_v61, %v4341_v33  ;;  %v2479_v26 = vcombine.low %v2475_v23, %v2476_v19 }
0x3a93   :  { %v3637_v22 = vpop.eup %3636 }
0x3a94   :  { %1994 = vst.msk [vmem:[#allocation10 + $0x3] ss:$8 sm:$0x3] %vm4345_vm1, %v1991_v15  ;;  %v2486_v58 = vrot.slane %v2479_v26, %v4341_v33  ;;  %v1716_v20 = vsel %vm1165_vm2, %v3637_v22, 0.0 }
0x3a96   :  { %v2493_v41 = vrot.slane %v2486_v58, %v4341_v33 }
0x3a97   :  { %v3639_v12 = vpop.eup %3638 }
0x3a98   :  { %2496 = vst.msk [vmem:[#allocation10 + $0x5] ss:$8 sm:$0x3] %vm4345_vm1, %v2493_v41  ;;  %v3641_v16 = vpop.eup %3640  ;;  %v1717_v3 = vsel %vm1165_vm2, %v3639_v12, 0.0 }
0x3a99   :  { %v3643_v27 = vpop.eup %3642  ;;  %v1718_v30 = vadd.f32 %v1717_v3, %v1716_v20  ;;  %v2218_v31 = vsel %vm1165_vm2, %v3641_v16, 0.0 }
0x3a9a   :  { %v2219_v32 = vsel %vm1165_vm2, %v3643_v27, 0.0 }
0x3a9b   :  { %v2220_v43 = vadd.f32 %v2219_v32, %v2218_v31 }
0x3b12   :  { %v2849_v51 = vpop.f32.mrb[22].mxu1  ;;  %v2919_v29 = vpop.f32.mrb[24].mxu0 }
0x3b13   :  { %v2924_v7 = vadd.f32 %v2919_v29, %v4027_v10  ;;  %v2850_v56 = vpop.f32.mrb[23].mxu1  ;;  %v3284_v8 = vpop.f32.mrb[25].mxu0 }
0x3b14   :  { %v2923_v34 = vadd.f32 %v2850_v56, %v4030_v11  ;;  %v3645_v10 = vpop.eup %3644 }
0x3b15   :  { %v2926_v13 = vsel %vm1165_vm2, %v2924_v7, -inf  ;;  %v3647_v11 = vpop.eup %3646  ;;  %v2720_v39 = vsel %vm1165_vm2, %v3645_v10, 0.0 }
0x3b16   :  { %v2925_v5 = vsel %vm1165_vm2, %v2923_v34, -inf  ;;  %v2721_v40 = vsel %vm1165_vm2, %v3647_v11, 0.0 }
0x3b17   :  { %v2927_v37 = vmax.f32 %v2925_v5, %v2926_v13  ;;  %v2722_v42 = vadd.f32 %v2721_v40, %v2720_v39 }
0x3b19   :  { %2928 = vmax.xlane.f32.xlu1 %v2927_v37 }
0x3b1d   :  { %1719 = vadd.xlane.f32.xlu1 %v1718_v30 }
0x3b21   :  { %2221 = vadd.xlane.f32.xlu1 %v2220_v43 }
0x3b25   :  { %2723 = vadd.xlane.f32.xlu1 %v2722_v42 }
0x3ba6   :  { %v2929_v9 = vpop.xlane.xlu1 %2928 }
0x3ba7   :  { %v2930_v44 = vsub.f32 %v2923_v34, %v2929_v9  ;;  %v2931_v57 = vsub.f32 %v2924_v7, %v2929_v9 }
0x3ba9   :  { %v2932_v0 = vmul.f32 1.442695, %v2930_v44  ;;  %v2934_v60 = vmul.f32 1.442695, %v2931_v57 }
0x3baa   :  { %v1720_v1 = vpop.xlane.xlu1 %1719 }
0x3bab   :  { %3648 = vpow2.f32 %v2932_v0 }
0x3bac   :  { %3650 = vpow2.f32 %v2934_v60 }
0x3bad   :  { %3652 = vrcp.f32 %v1720_v1 }
0x3bae   :  { %v2222_v46 = vpop.xlane.xlu1 %2221 }
0x3baf   :  { %3654 = vrcp.f32 %v2222_v46 }
0x3bb2   :  { %v2724_v59 = vpop.xlane.xlu1 %2723 }
0x3bb3   :  { %3656 = vrcp.f32 %v2724_v59 }
0x3bb5   :  { %v3649_v47 = vpop.eup %3648 }
0x3bb6   :  { %v3651_v48 = vpop.eup %3650  ;;  %v2936_v36 = vsel %vm1165_vm2, %v3649_v47, 0.0 }
0x3bb7   :  { %v3653_v50 = vpop.eup %3652  ;;  %v2937_v62 = vsel %vm1165_vm2, %v3651_v48, 0.0 }
0x3bb8   :  { %v1722_v52 = vmul.f32 %v3653_v50, %v3637_v22  ;;  %v1723_v54 = vmul.f32 %v3653_v50, %v3639_v12  ;;  %v2938_v63 = vadd.f32 %v2937_v62, %v2936_v36 }
0x3bb9   :  { %v3655_v55 = vpop.eup %3654 }
0x3bba   :  { %v1726_v17 = vcombine.low %v1722_v52, %v1723_v54  ;;  %v2224_v14 = vmul.f32 %v3655_v55, %v3641_v16  ;;  %v2225_v61 = vmul.f32 %v3655_v55, %v3643_v27  ;;  %2939 = vadd.xlane.f32.xlu0 %v2938_v63 }
0x3bbc   :  { %v1733_v23 = vrot.slane %v1726_v17, %v4341_v33  ;;  %v2228_v19 = vcombine.low %v2224_v14, %v2225_v61 }
0x3bbd   :  { %v3657_v15 = vpop.eup %3656 }
0x3bbe   :  { %v1740_v26 = vrot.slane %v1733_v23, %v4341_v33  ;;  %v2235_v58 = vrot.slane %v2228_v19, %v4341_v33  ;;  %v2726_v41 = vmul.f32 %v3657_v15, %v3645_v10  ;;  %v2727_v25 = vmul.f32 %v3657_v15, %v3647_v11 }
0x3bc0   :  { %1743 = vst.msk [vmem:[#allocation10 + $0x2] ss:$8 sm:$0x3] %vm4345_vm1, %v1740_v26  ;;  %v2242_v2 = vrot.slane %v2235_v58, %v4341_v33  ;;  %v2730_v38 = vcombine.low %v2726_v41, %v2727_v25 }
0x3bc2   :  { %2245 = vst.msk [vmem:[#allocation10 + $0x4] ss:$8 sm:$0x3] %vm4345_vm1, %v2242_v2  ;;  %v2737_v45 = vrot.slane %v2730_v38, %v4341_v33 }
0x3bc4   :  { %v2744_v4 = vrot.slane %v2737_v45, %v4341_v33 }
0x3bc6   :  { %2747 = vst.msk [vmem:[#allocation10 + $0x6] ss:$8 sm:$0x3] %vm4345_vm1, %v2744_v4 }
0x3c47   :  { %v2940_v18 = vpop.xlane.xlu0 %2939 }
0x3c48   :  { %3658 = vrcp.f32 %v2940_v18 }
0x3c52   :  { %v3659_v6 = vpop.eup %3658 }
0x3c53   :  { %v2942_v21 = vmul.f32 %v3659_v6, %v3649_v47  ;;  %v2943_v53 = vmul.f32 %v3659_v6, %v3651_v48 }
0x3c55   :  { %v2946_v28 = vcombine.low %v2942_v21, %v2943_v53 }
0x3c57   :  { %v2953_v24 = vrot.slane %v2946_v28, %v4341_v33 }
0x3c59   :  { %v2960_v35 = vrot.slane %v2953_v24, %v4341_v33 }
0x3c5b   :  { %2963 = vst.msk [vmem:[#allocation10 + $0x7] ss:$8 sm:$0x3] %vm4345_vm1, %v2960_v35 }
0x3c5c   :  { %3759 = shalt.err (!%p3756_p8)
}
0x3c5d   :  { %s3760_s14 = scalar_lea.hbm %s4421_s5, 256 }
0x3c5e   :  { %p3761_p9 = scmp.ne.s32.totalorder %s4421_s5, %s3760_s14  ;;  %p3764_p10 = scmp.lt.u32.totalorder %s3760_s14, %s4421_s5 }
0x3c60   :  { %p3766_p11 = pnand %p3764_p10, %p3761_p9 }
0x3c62   :  { %3769 = shalt.err (!%p3766_p11)
}
0x3c63   :  { %2974 = dma.vmem_to_hbm [thread:$0]  %s2972_s9, 256, %s4421_s5, [#allocation4]  }
0x3c64   :  { %3776 = dma.done.wait [#allocation4], 256  }
0x3c65   :  { %3777 = vsyncadd [#allocation4], 4294967040 }
0x3c66   :  { %2978 = vsyncpa [#allocation3], 1 }
0x3c67   :  { %2979 = vsyncpa [#allocation6], 1 }
0x3c68   :  { %2980 = vsyncpa [#allocation9], 1 }
0x3c69   :  { %2981 = vsyncpa [#allocation4], 1 }

</bundles_post_ra>
